<compile_context>
chip_gen: v7x
topology: tpu7x:2x2x1
jax: 0.10.0
libtpu: 0.0.40
codegen_flags: <defaults>
</compile_context>

<pallas_src>
import functools

import jax
import jax.numpy as jnp
from jax.experimental import pallas as pl
from jax.experimental.pallas import tpu as pltpu


# --------------------------------------------------------------- slab layout ---
def _round8(n):
    return ((n + 7) // 8) * 8


def _slab_layout(input_dim, hidden_dim):
    """Row offsets of each operand inside the packed (rows, 4H) weight slab.

    Every segment starts on an 8-row (f32 sublane tile) boundary so in-kernel
    static slices are tile-aligned loads.
    """
    H = hidden_dim
    sizes = [("w_ih0", input_dim), ("w_hh0", H), ("b0", 1),
             ("w_ih1", H), ("w_hh1", H), ("b1", 1),
             ("fc_w", H), ("fc_b", 1)]
    layout, off = {}, 0
    for name, rows in sizes:
        layout[name] = (off, rows)
        off += _round8(rows)
    return layout, off


# ------------------------------------------------------------------ kernel ---
def lstm_voice_kernel(x2d_ref, w_ref, out_ref, *, seq_len, batch_pad, hidden,
                      layout):
    """2-layer LSTM recurrence + time-mean + FC + log_softmax, single program.

    x2d_ref : (T*Bp, D) f32, time-major, batch padded to Bp (sublane tile).
    w_ref   : (rows, 4H) f32 packed slab; i/f/o gate columns and fused biases
              pre-scaled by 0.5 (sigmoid-via-tanh); fc bias pad lanes = -1e30.
    out_ref : (Bp, 4H) f32; real (B, L) block is the top-left corner.
    """
    T, Bp, H = seq_len, batch_pad, hidden
    G = 4 * H

    def seg(name):
        o, r = layout[name]
        return w_ref[o:o + r, :]

    w_hh0 = seg("w_hh0")
    w_ih1 = seg("w_ih1")
    w_hh1 = seg("w_hh1")

    # Hoisted layer-0 input projection: one (T*Bp, D) @ (D, 4H) matmul with
    # the fused (pre-scaled) bias, computed once.
    x_proj = (jnp.dot(x2d_ref[...], seg("w_ih0"),
                      preferred_element_type=jnp.float32) + seg("b0"))

    # Hoisted layer-1 bias broadcast (broadcast_in_dim is not CSE'd by JAX).
    b1b = jnp.broadcast_to(seg("b1"), (Bp, G))

    def gate_math(gates, c):
        # Single EUP push for all four gates: i/f/o pre-activations were
        # pre-scaled by 0.5, so sigmoid(x) == 0.5 * tanh(x/2) + 0.5.
        t = jnp.tanh(gates)                 # (Bp, 4H) vreg, one transcendental
        sg = 0.5 * t + 0.5                  # VPU FMA
        i = sg[:, 0 * H:1 * H]
        f = sg[:, 1 * H:2 * H]
        g = t[:, 2 * H:3 * H]               # g gate columns were NOT scaled
        o = sg[:, 3 * H:4 * H]
        c_new = f * c + i * g
        h_new = o * jnp.tanh(c_new)
        return h_new, c_new

    z = jnp.zeros((Bp, H), jnp.float32)
    h0, c0, h1, c1, acc = z, z, z, z, z

    # Fully unrolled serial recurrence (T is static and small); off-chain work
    # (h1 @ w_hh1 + b1, next x_proj slice) overlaps the dependent gate math.
    for t in range(T):
        g0 = (jnp.dot(h0, w_hh0, preferred_element_type=jnp.float32)
              + x_proj[t * Bp:(t + 1) * Bp, :])
        h0, c0 = gate_math(g0, c0)
        # Bias grouped with the previous-step-only operand so it retires while
        # the chain-critical dot(h0_new, w_ih1) is still in the MXU.
        off_chain = (jnp.dot(h1, w_hh1, preferred_element_type=jnp.float32)
                     + b1b)
        g1 = jnp.dot(h0, w_ih1, preferred_element_type=jnp.float32) + off_chain
        h1, c1 = gate_math(g1, c1)
        acc = acc + h1

    mean = acc * (1.0 / T)                  # torch.mean(lstm_out, 0)
    # fc epilogue on a full 128-lane vreg; pad label lanes carry -1e30 via the
    # packed fc bias, so max / log-sum-exp over lanes are unaffected.
    logits = (jnp.dot(mean, seg("fc_w"), preferred_element_type=jnp.float32)
              + seg("fc_b"))
    m = jnp.max(logits, axis=-1, keepdims=True)
    lse = jnp.log(jnp.sum(jnp.exp(logits - m), axis=-1, keepdims=True))
    out_ref[...] = (logits - m - lse).astype(out_ref.dtype)   # unmasked vst


# ----------------------------------------------------------------- wrapper ---
def lstm_voice_forward(x, w_slab, hidden_dim, num_labels):
    """x: (T, B, D) f32. w_slab: packed weights from pack_kernel_weights."""
    T, B, D = x.shape
    H = hidden_dim
    G = 4 * H
    Bp = _round8(max(B, 8))                 # pad batch to one f32 sublane tile

    x_pad = jnp.zeros((T, Bp, D), jnp.float32).at[:, :B, :].set(
        x.astype(jnp.float32))
    x2d = x_pad.reshape(T * Bp, D)          # lane-dense slab, consumed once

    layout, _ = _slab_layout(D, H)
    vmem = pl.BlockSpec(memory_space=pltpu.MemorySpace.VMEM)
    kernel = functools.partial(lstm_voice_kernel, seq_len=T, batch_pad=Bp,
                               hidden=H, layout=layout)
    out_pad = pl.pallas_call(
        kernel,
        out_shape=jax.ShapeDtypeStruct((Bp, G), jnp.float32),
        in_specs=[vmem, vmem],              # 2 prologue DMAs: x + weight slab
        out_specs=vmem,
    )(x2d, w_slab)
    return out_pad[:B, :num_labels]


# ------------------------------------------------------------ param builder ---
def init_params(key, input_dim, hidden_dim, num_labels):
    """Raw PyTorch-layout weights, uniform(-1/sqrt(H), 1/sqrt(H))."""
    H = hidden_dim
    ks = jax.random.split(key, 10)
    s = 1.0 / jnp.sqrt(H)
    u = lambda k, shape: jax.random.uniform(k, shape, jnp.float32, -s, s)
    return dict(
        w_ih0=u(ks[0], (4 * H, input_dim)), w_hh0=u(ks[1], (4 * H, H)),
        b_ih0=u(ks[2], (4 * H,)), b_hh0=u(ks[3], (4 * H,)),
        w_ih1=u(ks[4], (4 * H, H)), w_hh1=u(ks[5], (4 * H, H)),
        b_ih1=u(ks[6], (4 * H,)), b_hh1=u(ks[7], (4 * H,)),
        fc_w=u(ks[8], (num_labels, H)), fc_b=u(ks[9], (num_labels,)),
    )


def pack_kernel_weights(raw, input_dim, hidden_dim, num_labels):
    """Transpose / fuse / pre-scale and pack all weights into one (rows, 4H) slab.

    i/f/o gate columns (PyTorch gate order i, f, g, o) and the fused biases are
    scaled by 0.5 so the kernel can use sigmoid(x) = 0.5*tanh(x/2) + 0.5.
    fc is padded to 4H lanes; pad bias lanes hold -1e30 so log_softmax ignores
    them.
    """
    H, L = hidden_dim, num_labels
    G = 4 * H
    assert G % 128 == 0 and L <= G, "expected 4H lane-dense and num_labels <= 4H"

    col_scale = jnp.concatenate([
        jnp.full((H,), 0.5, jnp.float32),   # i
        jnp.full((H,), 0.5, jnp.float32),   # f
        jnp.ones((H,), jnp.float32),        # g (stays tanh)
        jnp.full((H,), 0.5, jnp.float32),   # o
    ])

    def lstm_layer(w_ih, w_hh, b_ih, b_hh):
        return (w_ih.T * col_scale[None, :],
                w_hh.T * col_scale[None, :],
                ((b_ih + b_hh) * col_scale)[None, :])

    w_ih0, w_hh0, b0 = lstm_layer(raw["w_ih0"], raw["w_hh0"],
                                  raw["b_ih0"], raw["b_hh0"])
    w_ih1, w_hh1, b1 = lstm_layer(raw["w_ih1"], raw["w_hh1"],
                                  raw["b_ih1"], raw["b_hh1"])
    fc_w = jnp.zeros((H, G), jnp.float32).at[:, :L].set(raw["fc_w"].T)
    fc_b = jnp.full((1, G), -1e30, jnp.float32).at[0, :L].set(raw["fc_b"])

    pieces = dict(w_ih0=w_ih0, w_hh0=w_hh0, b0=b0, w_ih1=w_ih1, w_hh1=w_hh1,
                  b1=b1, fc_w=fc_w, fc_b=fc_b)
    layout, total_rows = _slab_layout(input_dim, hidden_dim)
    slab = jnp.zeros((total_rows, G), jnp.float32)
    for name, (off, rows) in layout.items():
        slab = slab.at[off:off + rows, :].set(pieces[name])
    return slab


# -------------------------------------------------------- pure-JAX reference ---
def reference_forward(x, raw):
    T, B, _ = x.shape
    H = raw["w_hh0"].shape[1]

    def cell(x_t, h, c, w_ih, w_hh, b_ih, b_hh):
        g = x_t @ w_ih.T + h @ w_hh.T + b_ih + b_hh
        i = jax.nn.sigmoid(g[:, 0 * H:1 * H])
        f = jax.nn.sigmoid(g[:, 1 * H:2 * H])
        gg = jnp.tanh(g[:, 2 * H:3 * H])
        o = jax.nn.sigmoid(g[:, 3 * H:4 * H])
        c = f * c + i * gg
        return o * jnp.tanh(c), c

    h0 = c0 = h1 = c1 = jnp.zeros((B, H), jnp.float32)
    acc = jnp.zeros((B, H), jnp.float32)
    for t in range(T):
        h0, c0 = cell(x[t], h0, c0, raw["w_ih0"], raw["w_hh0"],
                      raw["b_ih0"], raw["b_hh0"])
        h1, c1 = cell(h0, h1, c1, raw["w_ih1"], raw["w_hh1"],
                      raw["b_ih1"], raw["b_hh1"])
        acc = acc + h1
    mean = acc / T
    logits = mean @ raw["fc_w"].T + raw["fc_b"]
    return jax.nn.log_softmax(logits, axis=1)


# -------------------------------------------------------------------- main ---
if __name__ == "__main__":
    # Small shapes consistent with LSTMVoice(input_dim, hidden_dim, depth=2,
    # batch_size, num_labels); input batch is (seq, batch, input_dim).
    SEQ, BATCH, INPUT_DIM, HIDDEN, NUM_LABELS = 8, 2, 16, 32, 10

    key = jax.random.PRNGKey(0)
    kx, kp = jax.random.split(key)
    x = jax.random.normal(kx, (SEQ, BATCH, INPUT_DIM), jnp.float32)
    raw_params = init_params(kp, INPUT_DIM, HIDDEN, NUM_LABELS)
    w_slab = pack_kernel_weights(raw_params, INPUT_DIM, HIDDEN, NUM_LABELS)

    scores = jax.block_until_ready(
        lstm_voice_forward(x, w_slab, HIDDEN, NUM_LABELS))
    ref = jax.block_until_ready(reference_forward(x, raw_params))

    assert scores.shape == (BATCH, NUM_LABELS)
    assert jnp.allclose(scores, ref, atol=1e-5, rtol=1e-5), (
        f"max diff {jnp.max(jnp.abs(scores - ref))}")
    print("KERNEL_OK")
</pallas_src>

<mosaic_0001>
module attributes {stable_mosaic.version = 11 : i64} {
  func.func @lstm_voice_kernel(%arg0: memref<64x16xf32, #tpu.memory_space<vmem>>, %arg1: memref<168x128xf32, #tpu.memory_space<vmem>>, %arg2: memref<8x128xf32, #tpu.memory_space<vmem>>) attributes {dimension_semantics = [], scalar_prefetch = 0 : i64, scratch_operands = 0 : i64, tpu.core_type = #tpu.core_type<tc>} {
    %c16 = arith.constant 16 : index
    %c0 = arith.constant 0 : index
    %0 = vector.load %arg1[%c16, %c0] : memref<168x128xf32, #tpu.memory_space<vmem>>, vector<32x128xf32>
    %c56 = arith.constant 56 : index
    %c0_0 = arith.constant 0 : index
    %1 = vector.load %arg1[%c56, %c0_0] : memref<168x128xf32, #tpu.memory_space<vmem>>, vector<32x128xf32>
    %c88 = arith.constant 88 : index
    %c0_1 = arith.constant 0 : index
    %2 = vector.load %arg1[%c88, %c0_1] : memref<168x128xf32, #tpu.memory_space<vmem>>, vector<32x128xf32>
    %c0_2 = arith.constant 0 : index
    %c0_3 = arith.constant 0 : index
    %3 = vector.load %arg0[%c0_2, %c0_3] : memref<64x16xf32, #tpu.memory_space<vmem>>, vector<64x16xf32>
    %c0_4 = arith.constant 0 : index
    %c0_5 = arith.constant 0 : index
    %4 = vector.load %arg1[%c0_4, %c0_5] : memref<168x128xf32, #tpu.memory_space<vmem>>, vector<16x128xf32>
    %cst = arith.constant dense<0.000000e+00> : vector<64x128xf32>
    %5 = tpu.matmul %3, %4, %cst {dimension_numbers = #tpu.dot_dimension_numbers<[1], [0], [0], [1], [0, 0, 1, 1], [], []>} : vector<64x16xf32>, vector<16x128xf32>, vector<64x128xf32> -> vector<64x128xf32>
    %c48 = arith.constant 48 : index
    %c0_6 = arith.constant 0 : index
    %6 = vector.load %arg1[%c48, %c0_6] : memref<168x128xf32, #tpu.memory_space<vmem>>, vector<1x128xf32>
    %7 = vector.broadcast %6 : vector<1x128xf32> to vector<64x128xf32>
    %8 = arith.addf %5, %7 : vector<64x128xf32>
    %c120 = arith.constant 120 : index
    %c0_7 = arith.constant 0 : index
    %9 = vector.load %arg1[%c120, %c0_7] : memref<168x128xf32, #tpu.memory_space<vmem>>, vector<1x128xf32>
    %10 = vector.shape_cast %9 : vector<1x128xf32> to vector<1x128xf32>
    %11 = vector.broadcast %10 : vector<1x128xf32> to vector<8x128xf32>
    %cst_8 = arith.constant 0.000000e+00 : f32
    %12 = vector.broadcast %cst_8 : f32 to vector<8x32xf32>
    %cst_9 = arith.constant dense<0.000000e+00> : vector<8x128xf32>
    %13 = tpu.matmul %12, %0, %cst_9 {dimension_numbers = #tpu.dot_dimension_numbers<[1], [0], [0], [1], [0, 0, 1, 1], [], []>} : vector<8x32xf32>, vector<32x128xf32>, vector<8x128xf32> -> vector<8x128xf32>
    %14 = vector.extract_strided_slice %8 {offsets = [0, 0], sizes = [8, 128], strides = [1, 1]} : vector<64x128xf32> to vector<8x128xf32>
    %15 = arith.addf %13, %14 : vector<8x128xf32>
    %16 = math.tanh %15 : vector<8x128xf32>
    %cst_10 = arith.constant 5.000000e-01 : f32
    %17 = vector.broadcast %cst_10 : f32 to vector<8x128xf32>
    %18 = arith.mulf %17, %16 : vector<8x128xf32>
    %cst_11 = arith.constant 5.000000e-01 : f32
    %19 = vector.broadcast %cst_11 : f32 to vector<8x128xf32>
    %20 = arith.addf %18, %19 : vector<8x128xf32>
    %21 = vector.extract_strided_slice %20 {offsets = [0, 0], sizes = [8, 32], strides = [1, 1]} : vector<8x128xf32> to vector<8x32xf32>
    %22 = vector.extract_strided_slice %20 {offsets = [0, 32], sizes = [8, 32], strides = [1, 1]} : vector<8x128xf32> to vector<8x32xf32>
    %23 = vector.extract_strided_slice %16 {offsets = [0, 64], sizes = [8, 32], strides = [1, 1]} : vector<8x128xf32> to vector<8x32xf32>
    %24 = vector.extract_strided_slice %20 {offsets = [0, 96], sizes = [8, 32], strides = [1, 1]} : vector<8x128xf32> to vector<8x32xf32>
    %25 = arith.mulf %22, %12 : vector<8x32xf32>
    %26 = arith.mulf %21, %23 : vector<8x32xf32>
    %27 = arith.addf %25, %26 : vector<8x32xf32>
    %28 = math.tanh %27 : vector<8x32xf32>
    %29 = arith.mulf %24, %28 : vector<8x32xf32>
    %cst_12 = arith.constant dense<0.000000e+00> : vector<8x128xf32>
    %30 = tpu.matmul %12, %2, %cst_12 {dimension_numbers = #tpu.dot_dimension_numbers<[1], [0], [0], [1], [0, 0, 1, 1], [], []>} : vector<8x32xf32>, vector<32x128xf32>, vector<8x128xf32> -> vector<8x128xf32>
    %31 = arith.addf %30, %11 : vector<8x128xf32>
    %cst_13 = arith.constant dense<0.000000e+00> : vector<8x128xf32>
    %32 = tpu.matmul %29, %1, %cst_13 {dimension_numbers = #tpu.dot_dimension_numbers<[1], [0], [0], [1], [0, 0, 1, 1], [], []>} : vector<8x32xf32>, vector<32x128xf32>, vector<8x128xf32> -> vector<8x128xf32>
    %33 = arith.addf %32, %31 : vector<8x128xf32>
    %34 = math.tanh %33 : vector<8x128xf32>
    %cst_14 = arith.constant 5.000000e-01 : f32
    %35 = vector.broadcast %cst_14 : f32 to vector<8x128xf32>
    %36 = arith.mulf %35, %34 : vector<8x128xf32>
    %cst_15 = arith.constant 5.000000e-01 : f32
    %37 = vector.broadcast %cst_15 : f32 to vector<8x128xf32>
    %38 = arith.addf %36, %37 : vector<8x128xf32>
    %39 = vector.extract_strided_slice %38 {offsets = [0, 0], sizes = [8, 32], strides = [1, 1]} : vector<8x128xf32> to vector<8x32xf32>
    %40 = vector.extract_strided_slice %38 {offsets = [0, 32], sizes = [8, 32], strides = [1, 1]} : vector<8x128xf32> to vector<8x32xf32>
    %41 = vector.extract_strided_slice %34 {offsets = [0, 64], sizes = [8, 32], strides = [1, 1]} : vector<8x128xf32> to vector<8x32xf32>
    %42 = vector.extract_strided_slice %38 {offsets = [0, 96], sizes = [8, 32], strides = [1, 1]} : vector<8x128xf32> to vector<8x32xf32>
    %43 = arith.mulf %40, %12 : vector<8x32xf32>
    %44 = arith.mulf %39, %41 : vector<8x32xf32>
    %45 = arith.addf %43, %44 : vector<8x32xf32>
    %46 = math.tanh %45 : vector<8x32xf32>
    %47 = arith.mulf %42, %46 : vector<8x32xf32>
    %48 = arith.addf %12, %47 : vector<8x32xf32>
    %cst_16 = arith.constant dense<0.000000e+00> : vector<8x128xf32>
    %49 = tpu.matmul %29, %0, %cst_16 {dimension_numbers = #tpu.dot_dimension_numbers<[1], [0], [0], [1], [0, 0, 1, 1], [], []>} : vector<8x32xf32>, vector<32x128xf32>, vector<8x128xf32> -> vector<8x128xf32>
    %50 = vector.extract_strided_slice %8 {offsets = [8, 0], sizes = [8, 128], strides = [1, 1]} : vector<64x128xf32> to vector<8x128xf32>
    %51 = arith.addf %49, %50 : vector<8x128xf32>
    %52 = math.tanh %51 : vector<8x128xf32>
    %cst_17 = arith.constant 5.000000e-01 : f32
    %53 = vector.broadcast %cst_17 : f32 to vector<8x128xf32>
    %54 = arith.mulf %53, %52 : vector<8x128xf32>
    %cst_18 = arith.constant 5.000000e-01 : f32
    %55 = vector.broadcast %cst_18 : f32 to vector<8x128xf32>
    %56 = arith.addf %54, %55 : vector<8x128xf32>
    %57 = vector.extract_strided_slice %56 {offsets = [0, 0], sizes = [8, 32], strides = [1, 1]} : vector<8x128xf32> to vector<8x32xf32>
    %58 = vector.extract_strided_slice %56 {offsets = [0, 32], sizes = [8, 32], strides = [1, 1]} : vector<8x128xf32> to vector<8x32xf32>
    %59 = vector.extract_strided_slice %52 {offsets = [0, 64], sizes = [8, 32], strides = [1, 1]} : vector<8x128xf32> to vector<8x32xf32>
    %60 = vector.extract_strided_slice %56 {offsets = [0, 96], sizes = [8, 32], strides = [1, 1]} : vector<8x128xf32> to vector<8x32xf32>
    %61 = arith.mulf %58, %27 : vector<8x32xf32>
    %62 = arith.mulf %57, %59 : vector<8x32xf32>
    %63 = arith.addf %61, %62 : vector<8x32xf32>
    %64 = math.tanh %63 : vector<8x32xf32>
    %65 = arith.mulf %60, %64 : vector<8x32xf32>
    %cst_19 = arith.constant dense<0.000000e+00> : vector<8x128xf32>
    %66 = tpu.matmul %47, %2, %cst_19 {dimension_numbers = #tpu.dot_dimension_numbers<[1], [0], [0], [1], [0, 0, 1, 1], [], []>} : vector<8x32xf32>, vector<32x128xf32>, vector<8x128xf32> -> vector<8x128xf32>
    %67 = arith.addf %66, %11 : vector<8x128xf32>
    %cst_20 = arith.constant dense<0.000000e+00> : vector<8x128xf32>
    %68 = tpu.matmul %65, %1, %cst_20 {dimension_numbers = #tpu.dot_dimension_numbers<[1], [0], [0], [1], [0, 0, 1, 1], [], []>} : vector<8x32xf32>, vector<32x128xf32>, vector<8x128xf32> -> vector<8x128xf32>
    %69 = arith.addf %68, %67 : vector<8x128xf32>
    %70 = math.tanh %69 : vector<8x128xf32>
    %cst_21 = arith.constant 5.000000e-01 : f32
    %71 = vector.broadcast %cst_21 : f32 to vector<8x128xf32>
    %72 = arith.mulf %71, %70 : vector<8x128xf32>
    %cst_22 = arith.constant 5.000000e-01 : f32
    %73 = vector.broadcast %cst_22 : f32 to vector<8x128xf32>
    %74 = arith.addf %72, %73 : vector<8x128xf32>
    %75 = vector.extract_strided_slice %74 {offsets = [0, 0], sizes = [8, 32], strides = [1, 1]} : vector<8x128xf32> to vector<8x32xf32>
    %76 = vector.extract_strided_slice %74 {offsets = [0, 32], sizes = [8, 32], strides = [1, 1]} : vector<8x128xf32> to vector<8x32xf32>
    %77 = vector.extract_strided_slice %70 {offsets = [0, 64], sizes = [8, 32], strides = [1, 1]} : vector<8x128xf32> to vector<8x32xf32>
    %78 = vector.extract_strided_slice %74 {offsets = [0, 96], sizes = [8, 32], strides = [1, 1]} : vector<8x128xf32> to vector<8x32xf32>
    %79 = arith.mulf %76, %45 : vector<8x32xf32>
    %80 = arith.mulf %75, %77 : vector<8x32xf32>
    %81 = arith.addf %79, %80 : vector<8x32xf32>
    %82 = math.tanh %81 : vector<8x32xf32>
    %83 = arith.mulf %78, %82 : vector<8x32xf32>
    %84 = arith.addf %48, %83 : vector<8x32xf32>
    %cst_23 = arith.constant dense<0.000000e+00> : vector<8x128xf32>
    %85 = tpu.matmul %65, %0, %cst_23 {dimension_numbers = #tpu.dot_dimension_numbers<[1], [0], [0], [1], [0, 0, 1, 1], [], []>} : vector<8x32xf32>, vector<32x128xf32>, vector<8x128xf32> -> vector<8x128xf32>
    %86 = vector.extract_strided_slice %8 {offsets = [16, 0], sizes = [8, 128], strides = [1, 1]} : vector<64x128xf32> to vector<8x128xf32>
    %87 = arith.addf %85, %86 : vector<8x128xf32>
    %88 = math.tanh %87 : vector<8x128xf32>
    %cst_24 = arith.constant 5.000000e-01 : f32
    %89 = vector.broadcast %cst_24 : f32 to vector<8x128xf32>
    %90 = arith.mulf %89, %88 : vector<8x128xf32>
    %cst_25 = arith.constant 5.000000e-01 : f32
    %91 = vector.broadcast %cst_25 : f32 to vector<8x128xf32>
    %92 = arith.addf %90, %91 : vector<8x128xf32>
    %93 = vector.extract_strided_slice %92 {offsets = [0, 0], sizes = [8, 32], strides = [1, 1]} : vector<8x128xf32> to vector<8x32xf32>
    %94 = vector.extract_strided_slice %92 {offsets = [0, 32], sizes = [8, 32], strides = [1, 1]} : vector<8x128xf32> to vector<8x32xf32>
    %95 = vector.extract_strided_slice %88 {offsets = [0, 64], sizes = [8, 32], strides = [1, 1]} : vector<8x128xf32> to vector<8x32xf32>
    %96 = vector.extract_strided_slice %92 {offsets = [0, 96], sizes = [8, 32], strides = [1, 1]} : vector<8x128xf32> to vector<8x32xf32>
    %97 = arith.mulf %94, %63 : vector<8x32xf32>
    %98 = arith.mulf %93, %95 : vector<8x32xf32>
    %99 = arith.addf %97, %98 : vector<8x32xf32>
    %100 = math.tanh %99 : vector<8x32xf32>
    %101 = arith.mulf %96, %100 : vector<8x32xf32>
    %cst_26 = arith.constant dense<0.000000e+00> : vector<8x128xf32>
    %102 = tpu.matmul %83, %2, %cst_26 {dimension_numbers = #tpu.dot_dimension_numbers<[1], [0], [0], [1], [0, 0, 1, 1], [], []>} : vector<8x32xf32>, vector<32x128xf32>, vector<8x128xf32> -> vector<8x128xf32>
    %103 = arith.addf %102, %11 : vector<8x128xf32>
    %cst_27 = arith.constant dense<0.000000e+00> : vector<8x128xf32>
    %104 = tpu.matmul %101, %1, %cst_27 {dimension_numbers = #tpu.dot_dimension_numbers<[1], [0], [0], [1], [0, 0, 1, 1], [], []>} : vector<8x32xf32>, vector<32x128xf32>, vector<8x128xf32> -> vector<8x128xf32>
    %105 = arith.addf %104, %103 : vector<8x128xf32>
    %106 = math.tanh %105 : vector<8x128xf32>
    %cst_28 = arith.constant 5.000000e-01 : f32
    %107 = vector.broadcast %cst_28 : f32 to vector<8x128xf32>
    %108 = arith.mulf %107, %106 : vector<8x128xf32>
    %cst_29 = arith.constant 5.000000e-01 : f32
    %109 = vector.broadcast %cst_29 : f32 to vector<8x128xf32>
    %110 = arith.addf %108, %109 : vector<8x128xf32>
    %111 = vector.extract_strided_slice %110 {offsets = [0, 0], sizes = [8, 32], strides = [1, 1]} : vector<8x128xf32> to vector<8x32xf32>
    %112 = vector.extract_strided_slice %110 {offsets = [0, 32], sizes = [8, 32], strides = [1, 1]} : vector<8x128xf32> to vector<8x32xf32>
    %113 = vector.extract_strided_slice %106 {offsets = [0, 64], sizes = [8, 32], strides = [1, 1]} : vector<8x128xf32> to vector<8x32xf32>
    %114 = vector.extract_strided_slice %110 {offsets = [0, 96], sizes = [8, 32], strides = [1, 1]} : vector<8x128xf32> to vector<8x32xf32>
    %115 = arith.mulf %112, %81 : vector<8x32xf32>
    %116 = arith.mulf %111, %113 : vector<8x32xf32>
    %117 = arith.addf %115, %116 : vector<8x32xf32>
    %118 = math.tanh %117 : vector<8x32xf32>
    %119 = arith.mulf %114, %118 : vector<8x32xf32>
    %120 = arith.addf %84, %119 : vector<8x32xf32>
    %cst_30 = arith.constant dense<0.000000e+00> : vector<8x128xf32>
    %121 = tpu.matmul %101, %0, %cst_30 {dimension_numbers = #tpu.dot_dimension_numbers<[1], [0], [0], [1], [0, 0, 1, 1], [], []>} : vector<8x32xf32>, vector<32x128xf32>, vector<8x128xf32> -> vector<8x128xf32>
    %122 = vector.extract_strided_slice %8 {offsets = [24, 0], sizes = [8, 128], strides = [1, 1]} : vector<64x128xf32> to vector<8x128xf32>
    %123 = arith.addf %121, %122 : vector<8x128xf32>
    %124 = math.tanh %123 : vector<8x128xf32>
    %cst_31 = arith.constant 5.000000e-01 : f32
    %125 = vector.broadcast %cst_31 : f32 to vector<8x128xf32>
    %126 = arith.mulf %125, %124 : vector<8x128xf32>
    %cst_32 = arith.constant 5.000000e-01 : f32
    %127 = vector.broadcast %cst_32 : f32 to vector<8x128xf32>
    %128 = arith.addf %126, %127 : vector<8x128xf32>
    %129 = vector.extract_strided_slice %128 {offsets = [0, 0], sizes = [8, 32], strides = [1, 1]} : vector<8x128xf32> to vector<8x32xf32>
    %130 = vector.extract_strided_slice %128 {offsets = [0, 32], sizes = [8, 32], strides = [1, 1]} : vector<8x128xf32> to vector<8x32xf32>
    %131 = vector.extract_strided_slice %124 {offsets = [0, 64], sizes = [8, 32], strides = [1, 1]} : vector<8x128xf32> to vector<8x32xf32>
    %132 = vector.extract_strided_slice %128 {offsets = [0, 96], sizes = [8, 32], strides = [1, 1]} : vector<8x128xf32> to vector<8x32xf32>
    %133 = arith.mulf %130, %99 : vector<8x32xf32>
    %134 = arith.mulf %129, %131 : vector<8x32xf32>
    %135 = arith.addf %133, %134 : vector<8x32xf32>
    %136 = math.tanh %135 : vector<8x32xf32>
    %137 = arith.mulf %132, %136 : vector<8x32xf32>
    %cst_33 = arith.constant dense<0.000000e+00> : vector<8x128xf32>
    %138 = tpu.matmul %119, %2, %cst_33 {dimension_numbers = #tpu.dot_dimension_numbers<[1], [0], [0], [1], [0, 0, 1, 1], [], []>} : vector<8x32xf32>, vector<32x128xf32>, vector<8x128xf32> -> vector<8x128xf32>
    %139 = arith.addf %138, %11 : vector<8x128xf32>
    %cst_34 = arith.constant dense<0.000000e+00> : vector<8x128xf32>
    %140 = tpu.matmul %137, %1, %cst_34 {dimension_numbers = #tpu.dot_dimension_numbers<[1], [0], [0], [1], [0, 0, 1, 1], [], []>} : vector<8x32xf32>, vector<32x128xf32>, vector<8x128xf32> -> vector<8x128xf32>
    %141 = arith.addf %140, %139 : vector<8x128xf32>
    %142 = math.tanh %141 : vector<8x128xf32>
    %cst_35 = arith.constant 5.000000e-01 : f32
    %143 = vector.broadcast %cst_35 : f32 to vector<8x128xf32>
    %144 = arith.mulf %143, %142 : vector<8x128xf32>
    %cst_36 = arith.constant 5.000000e-01 : f32
    %145 = vector.broadcast %cst_36 : f32 to vector<8x128xf32>
    %146 = arith.addf %144, %145 : vector<8x128xf32>
    %147 = vector.extract_strided_slice %146 {offsets = [0, 0], sizes = [8, 32], strides = [1, 1]} : vector<8x128xf32> to vector<8x32xf32>
    %148 = vector.extract_strided_slice %146 {offsets = [0, 32], sizes = [8, 32], strides = [1, 1]} : vector<8x128xf32> to vector<8x32xf32>
    %149 = vector.extract_strided_slice %142 {offsets = [0, 64], sizes = [8, 32], strides = [1, 1]} : vector<8x128xf32> to vector<8x32xf32>
    %150 = vector.extract_strided_slice %146 {offsets = [0, 96], sizes = [8, 32], strides = [1, 1]} : vector<8x128xf32> to vector<8x32xf32>
    %151 = arith.mulf %148, %117 : vector<8x32xf32>
    %152 = arith.mulf %147, %149 : vector<8x32xf32>
    %153 = arith.addf %151, %152 : vector<8x32xf32>
    %154 = math.tanh %153 : vector<8x32xf32>
    %155 = arith.mulf %150, %154 : vector<8x32xf32>
    %156 = arith.addf %120, %155 : vector<8x32xf32>
    %cst_37 = arith.constant dense<0.000000e+00> : vector<8x128xf32>
    %157 = tpu.matmul %137, %0, %cst_37 {dimension_numbers = #tpu.dot_dimension_numbers<[1], [0], [0], [1], [0, 0, 1, 1], [], []>} : vector<8x32xf32>, vector<32x128xf32>, vector<8x128xf32> -> vector<8x128xf32>
    %158 = vector.extract_strided_slice %8 {offsets = [32, 0], sizes = [8, 128], strides = [1, 1]} : vector<64x128xf32> to vector<8x128xf32>
    %159 = arith.addf %157, %158 : vector<8x128xf32>
    %160 = math.tanh %159 : vector<8x128xf32>
    %cst_38 = arith.constant 5.000000e-01 : f32
    %161 = vector.broadcast %cst_38 : f32 to vector<8x128xf32>
    %162 = arith.mulf %161, %160 : vector<8x128xf32>
    %cst_39 = arith.constant 5.000000e-01 : f32
    %163 = vector.broadcast %cst_39 : f32 to vector<8x128xf32>
    %164 = arith.addf %162, %163 : vector<8x128xf32>
    %165 = vector.extract_strided_slice %164 {offsets = [0, 0], sizes = [8, 32], strides = [1, 1]} : vector<8x128xf32> to vector<8x32xf32>
    %166 = vector.extract_strided_slice %164 {offsets = [0, 32], sizes = [8, 32], strides = [1, 1]} : vector<8x128xf32> to vector<8x32xf32>
    %167 = vector.extract_strided_slice %160 {offsets = [0, 64], sizes = [8, 32], strides = [1, 1]} : vector<8x128xf32> to vector<8x32xf32>
    %168 = vector.extract_strided_slice %164 {offsets = [0, 96], sizes = [8, 32], strides = [1, 1]} : vector<8x128xf32> to vector<8x32xf32>
    %169 = arith.mulf %166, %135 : vector<8x32xf32>
    %170 = arith.mulf %165, %167 : vector<8x32xf32>
    %171 = arith.addf %169, %170 : vector<8x32xf32>
    %172 = math.tanh %171 : vector<8x32xf32>
    %173 = arith.mulf %168, %172 : vector<8x32xf32>
    %cst_40 = arith.constant dense<0.000000e+00> : vector<8x128xf32>
    %174 = tpu.matmul %155, %2, %cst_40 {dimension_numbers = #tpu.dot_dimension_numbers<[1], [0], [0], [1], [0, 0, 1, 1], [], []>} : vector<8x32xf32>, vector<32x128xf32>, vector<8x128xf32> -> vector<8x128xf32>
    %175 = arith.addf %174, %11 : vector<8x128xf32>
    %cst_41 = arith.constant dense<0.000000e+00> : vector<8x128xf32>
    %176 = tpu.matmul %173, %1, %cst_41 {dimension_numbers = #tpu.dot_dimension_numbers<[1], [0], [0], [1], [0, 0, 1, 1], [], []>} : vector<8x32xf32>, vector<32x128xf32>, vector<8x128xf32> -> vector<8x128xf32>
    %177 = arith.addf %176, %175 : vector<8x128xf32>
    %178 = math.tanh %177 : vector<8x128xf32>
    %cst_42 = arith.constant 5.000000e-01 : f32
    %179 = vector.broadcast %cst_42 : f32 to vector<8x128xf32>
    %180 = arith.mulf %179, %178 : vector<8x128xf32>
    %cst_43 = arith.constant 5.000000e-01 : f32
    %181 = vector.broadcast %cst_43 : f32 to vector<8x128xf32>
    %182 = arith.addf %180, %181 : vector<8x128xf32>
    %183 = vector.extract_strided_slice %182 {offsets = [0, 0], sizes = [8, 32], strides = [1, 1]} : vector<8x128xf32> to vector<8x32xf32>
    %184 = vector.extract_strided_slice %182 {offsets = [0, 32], sizes = [8, 32], strides = [1, 1]} : vector<8x128xf32> to vector<8x32xf32>
    %185 = vector.extract_strided_slice %178 {offsets = [0, 64], sizes = [8, 32], strides = [1, 1]} : vector<8x128xf32> to vector<8x32xf32>
    %186 = vector.extract_strided_slice %182 {offsets = [0, 96], sizes = [8, 32], strides = [1, 1]} : vector<8x128xf32> to vector<8x32xf32>
    %187 = arith.mulf %184, %153 : vector<8x32xf32>
    %188 = arith.mulf %183, %185 : vector<8x32xf32>
    %189 = arith.addf %187, %188 : vector<8x32xf32>
    %190 = math.tanh %189 : vector<8x32xf32>
    %191 = arith.mulf %186, %190 : vector<8x32xf32>
    %192 = arith.addf %156, %191 : vector<8x32xf32>
    %cst_44 = arith.constant dense<0.000000e+00> : vector<8x128xf32>
    %193 = tpu.matmul %173, %0, %cst_44 {dimension_numbers = #tpu.dot_dimension_numbers<[1], [0], [0], [1], [0, 0, 1, 1], [], []>} : vector<8x32xf32>, vector<32x128xf32>, vector<8x128xf32> -> vector<8x128xf32>
    %194 = vector.extract_strided_slice %8 {offsets = [40, 0], sizes = [8, 128], strides = [1, 1]} : vector<64x128xf32> to vector<8x128xf32>
    %195 = arith.addf %193, %194 : vector<8x128xf32>
    %196 = math.tanh %195 : vector<8x128xf32>
    %cst_45 = arith.constant 5.000000e-01 : f32
    %197 = vector.broadcast %cst_45 : f32 to vector<8x128xf32>
    %198 = arith.mulf %197, %196 : vector<8x128xf32>
    %cst_46 = arith.constant 5.000000e-01 : f32
    %199 = vector.broadcast %cst_46 : f32 to vector<8x128xf32>
    %200 = arith.addf %198, %199 : vector<8x128xf32>
    %201 = vector.extract_strided_slice %200 {offsets = [0, 0], sizes = [8, 32], strides = [1, 1]} : vector<8x128xf32> to vector<8x32xf32>
    %202 = vector.extract_strided_slice %200 {offsets = [0, 32], sizes = [8, 32], strides = [1, 1]} : vector<8x128xf32> to vector<8x32xf32>
    %203 = vector.extract_strided_slice %196 {offsets = [0, 64], sizes = [8, 32], strides = [1, 1]} : vector<8x128xf32> to vector<8x32xf32>
    %204 = vector.extract_strided_slice %200 {offsets = [0, 96], sizes = [8, 32], strides = [1, 1]} : vector<8x128xf32> to vector<8x32xf32>
    %205 = arith.mulf %202, %171 : vector<8x32xf32>
    %206 = arith.mulf %201, %203 : vector<8x32xf32>
    %207 = arith.addf %205, %206 : vector<8x32xf32>
    %208 = math.tanh %207 : vector<8x32xf32>
    %209 = arith.mulf %204, %208 : vector<8x32xf32>
    %cst_47 = arith.constant dense<0.000000e+00> : vector<8x128xf32>
    %210 = tpu.matmul %191, %2, %cst_47 {dimension_numbers = #tpu.dot_dimension_numbers<[1], [0], [0], [1], [0, 0, 1, 1], [], []>} : vector<8x32xf32>, vector<32x128xf32>, vector<8x128xf32> -> vector<8x128xf32>
    %211 = arith.addf %210, %11 : vector<8x128xf32>
    %cst_48 = arith.constant dense<0.000000e+00> : vector<8x128xf32>
    %212 = tpu.matmul %209, %1, %cst_48 {dimension_numbers = #tpu.dot_dimension_numbers<[1], [0], [0], [1], [0, 0, 1, 1], [], []>} : vector<8x32xf32>, vector<32x128xf32>, vector<8x128xf32> -> vector<8x128xf32>
    %213 = arith.addf %212, %211 : vector<8x128xf32>
    %214 = math.tanh %213 : vector<8x128xf32>
    %cst_49 = arith.constant 5.000000e-01 : f32
    %215 = vector.broadcast %cst_49 : f32 to vector<8x128xf32>
    %216 = arith.mulf %215, %214 : vector<8x128xf32>
    %cst_50 = arith.constant 5.000000e-01 : f32
    %217 = vector.broadcast %cst_50 : f32 to vector<8x128xf32>
    %218 = arith.addf %216, %217 : vector<8x128xf32>
    %219 = vector.extract_strided_slice %218 {offsets = [0, 0], sizes = [8, 32], strides = [1, 1]} : vector<8x128xf32> to vector<8x32xf32>
    %220 = vector.extract_strided_slice %218 {offsets = [0, 32], sizes = [8, 32], strides = [1, 1]} : vector<8x128xf32> to vector<8x32xf32>
    %221 = vector.extract_strided_slice %214 {offsets = [0, 64], sizes = [8, 32], strides = [1, 1]} : vector<8x128xf32> to vector<8x32xf32>
    %222 = vector.extract_strided_slice %218 {offsets = [0, 96], sizes = [8, 32], strides = [1, 1]} : vector<8x128xf32> to vector<8x32xf32>
    %223 = arith.mulf %220, %189 : vector<8x32xf32>
    %224 = arith.mulf %219, %221 : vector<8x32xf32>
    %225 = arith.addf %223, %224 : vector<8x32xf32>
    %226 = math.tanh %225 : vector<8x32xf32>
    %227 = arith.mulf %222, %226 : vector<8x32xf32>
    %228 = arith.addf %192, %227 : vector<8x32xf32>
    %cst_51 = arith.constant dense<0.000000e+00> : vector<8x128xf32>
    %229 = tpu.matmul %209, %0, %cst_51 {dimension_numbers = #tpu.dot_dimension_numbers<[1], [0], [0], [1], [0, 0, 1, 1], [], []>} : vector<8x32xf32>, vector<32x128xf32>, vector<8x128xf32> -> vector<8x128xf32>
    %230 = vector.extract_strided_slice %8 {offsets = [48, 0], sizes = [8, 128], strides = [1, 1]} : vector<64x128xf32> to vector<8x128xf32>
    %231 = arith.addf %229, %230 : vector<8x128xf32>
    %232 = math.tanh %231 : vector<8x128xf32>
    %cst_52 = arith.constant 5.000000e-01 : f32
    %233 = vector.broadcast %cst_52 : f32 to vector<8x128xf32>
    %234 = arith.mulf %233, %232 : vector<8x128xf32>
    %cst_53 = arith.constant 5.000000e-01 : f32
    %235 = vector.broadcast %cst_53 : f32 to vector<8x128xf32>
    %236 = arith.addf %234, %235 : vector<8x128xf32>
    %237 = vector.extract_strided_slice %236 {offsets = [0, 0], sizes = [8, 32], strides = [1, 1]} : vector<8x128xf32> to vector<8x32xf32>
    %238 = vector.extract_strided_slice %236 {offsets = [0, 32], sizes = [8, 32], strides = [1, 1]} : vector<8x128xf32> to vector<8x32xf32>
    %239 = vector.extract_strided_slice %232 {offsets = [0, 64], sizes = [8, 32], strides = [1, 1]} : vector<8x128xf32> to vector<8x32xf32>
    %240 = vector.extract_strided_slice %236 {offsets = [0, 96], sizes = [8, 32], strides = [1, 1]} : vector<8x128xf32> to vector<8x32xf32>
    %241 = arith.mulf %238, %207 : vector<8x32xf32>
    %242 = arith.mulf %237, %239 : vector<8x32xf32>
    %243 = arith.addf %241, %242 : vector<8x32xf32>
    %244 = math.tanh %243 : vector<8x32xf32>
    %245 = arith.mulf %240, %244 : vector<8x32xf32>
    %cst_54 = arith.constant dense<0.000000e+00> : vector<8x128xf32>
    %246 = tpu.matmul %227, %2, %cst_54 {dimension_numbers = #tpu.dot_dimension_numbers<[1], [0], [0], [1], [0, 0, 1, 1], [], []>} : vector<8x32xf32>, vector<32x128xf32>, vector<8x128xf32> -> vector<8x128xf32>
    %247 = arith.addf %246, %11 : vector<8x128xf32>
    %cst_55 = arith.constant dense<0.000000e+00> : vector<8x128xf32>
    %248 = tpu.matmul %245, %1, %cst_55 {dimension_numbers = #tpu.dot_dimension_numbers<[1], [0], [0], [1], [0, 0, 1, 1], [], []>} : vector<8x32xf32>, vector<32x128xf32>, vector<8x128xf32> -> vector<8x128xf32>
    %249 = arith.addf %248, %247 : vector<8x128xf32>
    %250 = math.tanh %249 : vector<8x128xf32>
    %cst_56 = arith.constant 5.000000e-01 : f32
    %251 = vector.broadcast %cst_56 : f32 to vector<8x128xf32>
    %252 = arith.mulf %251, %250 : vector<8x128xf32>
    %cst_57 = arith.constant 5.000000e-01 : f32
    %253 = vector.broadcast %cst_57 : f32 to vector<8x128xf32>
    %254 = arith.addf %252, %253 : vector<8x128xf32>
    %255 = vector.extract_strided_slice %254 {offsets = [0, 0], sizes = [8, 32], strides = [1, 1]} : vector<8x128xf32> to vector<8x32xf32>
    %256 = vector.extract_strided_slice %254 {offsets = [0, 32], sizes = [8, 32], strides = [1, 1]} : vector<8x128xf32> to vector<8x32xf32>
    %257 = vector.extract_strided_slice %250 {offsets = [0, 64], sizes = [8, 32], strides = [1, 1]} : vector<8x128xf32> to vector<8x32xf32>
    %258 = vector.extract_strided_slice %254 {offsets = [0, 96], sizes = [8, 32], strides = [1, 1]} : vector<8x128xf32> to vector<8x32xf32>
    %259 = arith.mulf %256, %225 : vector<8x32xf32>
    %260 = arith.mulf %255, %257 : vector<8x32xf32>
    %261 = arith.addf %259, %260 : vector<8x32xf32>
    %262 = math.tanh %261 : vector<8x32xf32>
    %263 = arith.mulf %258, %262 : vector<8x32xf32>
    %264 = arith.addf %228, %263 : vector<8x32xf32>
    %cst_58 = arith.constant dense<0.000000e+00> : vector<8x128xf32>
    %265 = tpu.matmul %245, %0, %cst_58 {dimension_numbers = #tpu.dot_dimension_numbers<[1], [0], [0], [1], [0, 0, 1, 1], [], []>} : vector<8x32xf32>, vector<32x128xf32>, vector<8x128xf32> -> vector<8x128xf32>
    %266 = vector.extract_strided_slice %8 {offsets = [56, 0], sizes = [8, 128], strides = [1, 1]} : vector<64x128xf32> to vector<8x128xf32>
    %267 = arith.addf %265, %266 : vector<8x128xf32>
    %268 = math.tanh %267 : vector<8x128xf32>
    %cst_59 = arith.constant 5.000000e-01 : f32
    %269 = vector.broadcast %cst_59 : f32 to vector<8x128xf32>
    %270 = arith.mulf %269, %268 : vector<8x128xf32>
    %cst_60 = arith.constant 5.000000e-01 : f32
    %271 = vector.broadcast %cst_60 : f32 to vector<8x128xf32>
    %272 = arith.addf %270, %271 : vector<8x128xf32>
    %273 = vector.extract_strided_slice %272 {offsets = [0, 0], sizes = [8, 32], strides = [1, 1]} : vector<8x128xf32> to vector<8x32xf32>
    %274 = vector.extract_strided_slice %272 {offsets = [0, 32], sizes = [8, 32], strides = [1, 1]} : vector<8x128xf32> to vector<8x32xf32>
    %275 = vector.extract_strided_slice %268 {offsets = [0, 64], sizes = [8, 32], strides = [1, 1]} : vector<8x128xf32> to vector<8x32xf32>
    %276 = vector.extract_strided_slice %272 {offsets = [0, 96], sizes = [8, 32], strides = [1, 1]} : vector<8x128xf32> to vector<8x32xf32>
    %277 = arith.mulf %274, %243 : vector<8x32xf32>
    %278 = arith.mulf %273, %275 : vector<8x32xf32>
    %279 = arith.addf %277, %278 : vector<8x32xf32>
    %280 = math.tanh %279 : vector<8x32xf32>
    %281 = arith.mulf %276, %280 : vector<8x32xf32>
    %cst_61 = arith.constant dense<0.000000e+00> : vector<8x128xf32>
    %282 = tpu.matmul %263, %2, %cst_61 {dimension_numbers = #tpu.dot_dimension_numbers<[1], [0], [0], [1], [0, 0, 1, 1], [], []>} : vector<8x32xf32>, vector<32x128xf32>, vector<8x128xf32> -> vector<8x128xf32>
    %283 = arith.addf %282, %11 : vector<8x128xf32>
    %cst_62 = arith.constant dense<0.000000e+00> : vector<8x128xf32>
    %284 = tpu.matmul %281, %1, %cst_62 {dimension_numbers = #tpu.dot_dimension_numbers<[1], [0], [0], [1], [0, 0, 1, 1], [], []>} : vector<8x32xf32>, vector<32x128xf32>, vector<8x128xf32> -> vector<8x128xf32>
    %285 = arith.addf %284, %283 : vector<8x128xf32>
    %286 = math.tanh %285 : vector<8x128xf32>
    %cst_63 = arith.constant 5.000000e-01 : f32
    %287 = vector.broadcast %cst_63 : f32 to vector<8x128xf32>
    %288 = arith.mulf %287, %286 : vector<8x128xf32>
    %cst_64 = arith.constant 5.000000e-01 : f32
    %289 = vector.broadcast %cst_64 : f32 to vector<8x128xf32>
    %290 = arith.addf %288, %289 : vector<8x128xf32>
    %291 = vector.extract_strided_slice %290 {offsets = [0, 0], sizes = [8, 32], strides = [1, 1]} : vector<8x128xf32> to vector<8x32xf32>
    %292 = vector.extract_strided_slice %290 {offsets = [0, 32], sizes = [8, 32], strides = [1, 1]} : vector<8x128xf32> to vector<8x32xf32>
    %293 = vector.extract_strided_slice %286 {offsets = [0, 64], sizes = [8, 32], strides = [1, 1]} : vector<8x128xf32> to vector<8x32xf32>
    %294 = vector.extract_strided_slice %290 {offsets = [0, 96], sizes = [8, 32], strides = [1, 1]} : vector<8x128xf32> to vector<8x32xf32>
    %295 = arith.mulf %292, %261 : vector<8x32xf32>
    %296 = arith.mulf %291, %293 : vector<8x32xf32>
    %297 = arith.addf %295, %296 : vector<8x32xf32>
    %298 = math.tanh %297 : vector<8x32xf32>
    %299 = arith.mulf %294, %298 : vector<8x32xf32>
    %300 = arith.addf %264, %299 : vector<8x32xf32>
    %cst_65 = arith.constant 1.250000e-01 : f32
    %301 = vector.broadcast %cst_65 : f32 to vector<8x32xf32>
    %302 = arith.mulf %300, %301 : vector<8x32xf32>
    %c128 = arith.constant 128 : index
    %c0_66 = arith.constant 0 : index
    %303 = vector.load %arg1[%c128, %c0_66] : memref<168x128xf32, #tpu.memory_space<vmem>>, vector<32x128xf32>
    %cst_67 = arith.constant dense<0.000000e+00> : vector<8x128xf32>
    %304 = tpu.matmul %302, %303, %cst_67 {dimension_numbers = #tpu.dot_dimension_numbers<[1], [0], [0], [1], [0, 0, 1, 1], [], []>} : vector<8x32xf32>, vector<32x128xf32>, vector<8x128xf32> -> vector<8x128xf32>
    %c160 = arith.constant 160 : index
    %c0_68 = arith.constant 0 : index
    %305 = vector.load %arg1[%c160, %c0_68] : memref<168x128xf32, #tpu.memory_space<vmem>>, vector<1x128xf32>
    %306 = vector.broadcast %305 : vector<1x128xf32> to vector<8x128xf32>
    %307 = arith.addf %304, %306 : vector<8x128xf32>
    %cst_69 = arith.constant dense<0xFF800000> : vector<8xf32>
    %308 = vector.multi_reduction <maximumf>, %307, %cst_69 [1] : vector<8x128xf32> to vector<8xf32>
    %309 = vector.shape_cast %308 : vector<8xf32> to vector<8x1xf32>
    %310 = vector.broadcast %309 : vector<8x1xf32> to vector<8x128xf32>
    %311 = arith.subf %307, %310 : vector<8x128xf32>
    %312 = math.exp %311 : vector<8x128xf32>
    %cst_70 = arith.constant dense<0.000000e+00> : vector<8xf32>
    %313 = vector.multi_reduction <add>, %312, %cst_70 [1] : vector<8x128xf32> to vector<8xf32>
    %314 = vector.shape_cast %313 : vector<8xf32> to vector<8x1xf32>
    %315 = math.log %314 : vector<8x1xf32>
    %316 = vector.broadcast %309 : vector<8x1xf32> to vector<8x128xf32>
    %317 = arith.subf %307, %316 : vector<8x128xf32>
    %318 = vector.broadcast %315 : vector<8x1xf32> to vector<8x128xf32>
    %319 = arith.subf %317, %318 : vector<8x128xf32>
    %c0_71 = arith.constant 0 : index
    %c0_72 = arith.constant 0 : index
    %320 = vector.load %arg2[%c0_71, %c0_72] : memref<8x128xf32, #tpu.memory_space<vmem>>, vector<8x128xf32>
    tpu.vector_store %arg2[%c0_71, %c0_72], %319 {strides = array<i32>} : memref<8x128xf32, #tpu.memory_space<vmem>>, vector<8x128xf32>,
    return
  }
}

</mosaic_0001>

<bundles_post_ra>
// kernel: tpu_custom_call.1
= control target key start
LH: loop header
LB: loop body
LE: loop exit
PB: predicated region body
PF: predicated region fallthrough
CT: control target
= control target key end

     0   :  { %7 = vsyncpa [#allocation3], 0  ;;  %s3527_s0 = inlined_call_operand.vmem [shape: f32[64,16], index: 0, kind: input, shape index: {}]   ;;  %s3528_s1 = inlined_call_operand.hbm [shape: f32[168,128], index: 1, kind: input, shape index: {}]   ;;  %s3529_s2 = inlined_call_operand.hbm [shape: f32[8,128], index: 2, kind: output, shape index: {}]  }
   0x1   :  { %8 = vsyncpa [#allocation4], 0  ;;  %s3149_s9 = smov [#allocation2]   ;;  %s3101_s13 = scalar_lea.hbm %s3528_s1, 2688 }
   0x2   :  { %s16_s10 = sshll.u32 %s3149_s9, 4  ;;  %p3102_p0 = scmp.ne.s32.totalorder %s3528_s1, %s3101_s13  ;;  %s17_s10 = int_to_ptr.vmem [resolvable:$true] %s16_s10 }
   0x3   :  { %p3105_p1 = scmp.lt.u32.totalorder %s3101_s13, %s3528_s1 }
   0x5   :  { %p3107_p2 = pnand %p3105_p1, %p3102_p0 }
   0x7   :  { %3110 = shalt.err (!%p3107_p2)
}
   0x8   :  { %s3111_s18 = scalar_lea.vmem %s17_s10, 2688  ;;  %p3116_p4 = scmp.lt.s32.totalorder %s17_s10, %s17_s10 }
   0x9   :  { %p3112_p3 = scmp.ne.s32.totalorder %s17_s10, %s3111_s18  ;;  %p3117_p5 = scmp.lt.s32.totalorder %s3111_s18, %s3111_s18 }
   0xb   :  { %p3118_p6 = por %p3117_p5, %p3116_p4 }
   0xd   :  { %p3119_p7 = pnand %p3118_p6, %p3112_p3 }
   0xf   :  { %3122 = shalt.err (!%p3119_p7)
}
  0x10   :  { %s3150_s19 = smov 128   ;;  %s3151_s20 = smov 8  }
  0x11   :  { %22 = dma.hbm_to_vmem [thread:$0]  %s3528_s1, 2688, %s17_s10, [#allocation3], %s3150_s19, %s3150_s19, %s3151_s20  }
  0x12   :  { %3145 = dma.done.wait [#allocation3], 2688  }
  0x13   :  { %3146 = vsyncadd [#allocation3], 4294964608  ;;  %v3152_v0 = vmov 0.0|0.0   ;;  %vm3153_vm0 = vmmov 0   ;;  %v3154_v1 = vmov 0.0   ;;  %vm53_vm1 = vcmask 130048  }
  0x14   :  { %2850 = vmatprep.subr.bf16.mxu1 %v3152_v0  ;;  %2579 = vmatprep.mubr.msk.f32.mxu1 %vm3153_vm0, %v3154_v1  ;;  %v46_v2 = vld [vmem:[#allocation2] sm:$0xff]  ;;  %v47_v3 = vld [vmem:[#allocation2 + $0x8] sm:$0xff]  ;;  %v26_v4 = vld [vmem:[#allocation2 + $0x10] sm:$0xff]  ;;  %s3155_s26 = smov 64   ;;  %s3156_s27 = smov 32   ;;  %vm188_vm2 = vcmask 261120  }
  0x15   :  { %v2846_v5 = vpack.c.bf16 %v47_v3, %v46_v2  ;;  %v27_v6 = vld [vmem:[#allocation2 + $0x18] sm:$0xff]  ;;  %v38_v7 = vld [vmem:[%s3527_s0] sm:$0xff]  ;;  %v29_v10 = vld [vmem:[#allocation2 + $0x28] sm:$0xff] }
  0x16   :  { %v3191_v8 = vpack.c.bf16 %v27_v6, %v26_v4  ;;  %2559 = vmatprep.mubr.msk.f32.mxu0 %vm53_vm1, %v38_v7  ;;  %v28_v9 = vld [vmem:[#allocation2 + $0x20] sm:$0xff]  ;;  %v39_v11 = vld [vmem:[%s3527_s0 + $0x8] sm:$0xff]  ;;  %v3212_v13 = vld [vmem:[#allocation2 + $0x30] ss:$0 sm:$0xff] }
  0x17   :  { %2847 = vmatprep.subr.bf16.mxu0 %v2846_v5  ;;  %v3198_v12 = vpack.c.bf16 %v29_v10, %v28_v9  ;;  %v34_v28 = vld [vmem:[#allocation2 + $0x58] sm:$0xff]  ;;  %v35_v29 = vld [vmem:[#allocation2 + $0x60] sm:$0xff]  ;;  %v40_v30 = vld [vmem:[%s3527_s0 + $0x10] sm:$0xff] }
  0x18   :  { %2852 = vmatpush3.bf16.msra.mxu1 %v3191_v8  ;;  %2849 = vmatpush3.bf16.msra.mxu0 %v2846_v5  ;;  %v3225_v31 = vpack.c.bf16 %v35_v29, %v34_v28  ;;  %v41_v32 = vld [vmem:[%s3527_s0 + $0x18] sm:$0xff]  ;;  %v36_v33 = vld [vmem:[#allocation2 + $0x68] sm:$0xff]  ;;  %v37_v34 = vld [vmem:[#allocation2 + $0x70] sm:$0xff] }
  0x19   :  { %2853 = vmatprep.subr.bf16.mxu1 %v3152_v0  ;;  %2868 = vmatprep.subr.bf16.mxu0 %v3152_v0  ;;  %v42_v35 = vld [vmem:[%s3527_s0 + $0x20] sm:$0xff]  ;;  %v3236_v36 = vpack.c.bf16 %v37_v34, %v36_v33  ;;  %v43_v37 = vld [vmem:[%s3527_s0 + $0x28] sm:$0xff]  ;;  %v30_v38 = vld [vmem:[#allocation2 + $0x38] sm:$0xff] }
  0x1a   :  { %v31_v39 = vld [vmem:[#allocation2 + $0x40] sm:$0xff]  ;;  %v44_v40 = vld [vmem:[%s3527_s0 + $0x30] sm:$0xff]  ;;  %v45_v42 = vld [vmem:[%s3527_s0 + $0x38] sm:$0xff]  ;;  %s3157_s0 = smov [#allocation5]  }
  0x1b   :  { %2560 = vmatmul.mubr.msk.f32.vlgmr.msra.gmra.mrb[0].mxu0 %vm53_vm1, %v39_v11  ;;  %v3248_v41 = vpack.c.bf16 %v31_v39, %v30_v38  ;;  %v32_v43 = vld [vmem:[#allocation2 + $0x48] sm:$0xff]  ;;  %v33_v44 = vld [vmem:[#allocation2 + $0x50] sm:$0xff]  ;;  %v3295_v56 = vld [vmem:[#allocation2 + $0x78] ss:$0 sm:$0xff]  ;;  %s2377_s12 = sshll.u32 %s3157_s0, 4  ;;  %s2378_s12 = int_to_ptr.vmem [resolvable:$true] %s2377_s12 }
  0x1c   :  { %2855 = vmatpush3.bf16.msra.mxu1 %v3198_v12  ;;  %2870 = vmatpush3.bf16.msra.mxu0 %v3191_v8  ;;  %v3259_v46 = vpack.c.bf16 %v33_v44, %v32_v43  ;;  %s3123_s13 = scalar_lea.vmem %s2378_s12, 128  ;;  %p3128_p9 = scmp.lt.s32.totalorder %s2378_s12, %s2378_s12 }
  0x1d   :  { %2856 = vmatprep.subr.bf16.mxu1 %v3152_v0  ;;  %2871 = vmatprep.subr.bf16.mxu0 %v3152_v0  ;;  %p3124_p8 = scmp.ne.s32.totalorder %s2378_s12, %s3123_s13  ;;  %p3129_p10 = scmp.lt.s32.totalorder %s3123_s13, %s3123_s13 }
  0x1e   :  { %2562 = vmatprep.mubr.msk.f32.mxu0 %vm53_vm1, %v40_v30 }
  0x1f   :  { %2580 = vmatmul.mubr.f32.vlgmr.msra.gmra.mrb[0].mxu1 %v3154_v1  ;;  %2563 = vmatmul.mubr.msk.f32.gmra.mrb[2].mxu0 %vm53_vm1, %v41_v32  ;;  %p3130_p11 = por %p3129_p10, %p3128_p9 }
  0x20   :  { %2590 = vmatprep.mubr.msk.f32.mxu1 %vm3153_vm0, %v3154_v1  ;;  %2873 = vmatpush3.bf16.msra.mxu0 %v3198_v12 }
  0x21   :  { %2874 = vmatprep.subr.bf16.mxu0 %v3152_v0  ;;  %2858 = vmatpush3.bf16.msra.mxu1 %v3225_v31  ;;  %p3131_p12 = pnand %p3130_p11, %p3124_p8 }
  0x22   :  { %2565 = vmatprep.mubr.msk.f32.mxu0 %vm53_vm1, %v42_v35  ;;  %2859 = vmatprep.subr.bf16.mxu1 %v3152_v0 }
  0x23   :  { %2566 = vmatmul.mubr.msk.f32.gmra.mrb[4].mxu0 %vm53_vm1, %v43_v37 }
  0x24   :  { %2568 = vmatprep.mubr.msk.f32.mxu0 %vm53_vm1, %v44_v40 }
  0x25   :  { %2861 = vmatpush3.bf16.msra.mxu1 %v3236_v36 }
  0x26   :  { %2862 = vmatprep.subr.bf16.mxu1 %v3152_v0 }
  0x27   :  { %2569 = vmatmul.mubr.msk.f32.gmra.mrb[6].mxu0 %vm53_vm1, %v45_v42 }
  0x28   :  { %2591 = vmatmul.mubr.f32.vlgmr.msra.gmra.mrb[2].mxu1 %v3154_v1  ;;  %2612 = vmatprep.mubr.msk.f32.mxu0 %vm3153_vm0, %v3154_v1 }
  0x29   :  { %2864 = vmatpush3.bf16.msra.mxu1 %v3248_v41  ;;  %2601 = vmatprep.mubr.msk.f32.mxu1 %vm3153_vm0, %v3154_v1 }
  0x2a   :  { %2865 = vmatprep.subr.bf16.mxu1 %v3152_v0 }
  0x2d   :  { %2867 = vmatpush3.bf16.msra.mxu1 %v3259_v46 }
  0x2e   :  { %2886 = vmatprep.subr.bf16.mxu1 %v3152_v0 }
  0xee   :  { %v3214_v14 = vpop.f32.mrb[0].mxu0 }
  0xef   :  { %v144_v15 = vpop.f32.mrb[1].mxu0  ;;  %v150_v57 = vadd.f32 %v3214_v14, %v3212_v13 }
  0xf0   :  { %v145_v16 = vadd.f32 %v3212_v13, %v144_v15 }
  0xf2   :  { %v258_v17 = vpop.f32.mrb[0].mxu1  ;;  %v3269_v49 = vpop.f32.mrb[2].mxu0 }
  0xf3   :  { %v259_v18 = vadd.f32 %v258_v17, %v145_v16  ;;  %v2581_v19 = vpop.f32.mrb[1].mxu1  ;;  %v3271_v50 = vpop.f32.mrb[3].mxu0 }
  0xf4   :  { %v155_v29 = vadd.f32 %v3212_v13, %v3271_v50 }
  0xf5   :  { %3033 = vtanh.f32 %v259_v18 }
  0xf6   :  { %v3273_v51 = vpop.f32.mrb[4].mxu0 }
  0xf7   :  { %v3275_v52 = vpop.f32.mrb[5].mxu0 }
  0xfa   :  { %v3277_v53 = vpop.f32.mrb[6].mxu0 }
  0xfb   :  { %v3279_v54 = vpop.f32.mrb[7].mxu0 }
  0xff   :  { %v3034_v20 = vpop.eup %3033 }
 0x100   :  { %267 = vrot.lane.b32.xlu0 %v3034_v20, %s3155_s26  ;;  %v263_v21 = vmul.f32 0.5, %v3034_v20 }
 0x102   :  { %v264_v22 = vadd.f32 0.5, %v263_v21 }
 0x104   :  { %v265_v25 = vmul.f32 0.0, %v264_v22 }
 0x172   :  { %v268_v23 = vpop.permute.xlu0 %267 }
 0x173   :  { %v270_v24 = vmul.f32 %v268_v23, %v264_v22 }
 0x175   :  { %272 = vrot.lane.b32.xlu0 %v270_v24, %s3156_s27 }
 0x1e7   :  { %v273_v26 = vpop.permute.xlu0 %272 }
 0x1e8   :  { %v3219_v27 = vadd.f32 %v273_v26, %v265_v25 }
 0x1ea   :  { %3035 = vtanh.f32 %v3219_v27 }
 0x1f4   :  { %v3036_v45 = vpop.eup %3035 }
 0x1f5   :  { %278 = vrot.lane.b32.xlu1 %v3036_v45, %s3155_s26 }
 0x267   :  { %v279_v47 = vpop.permute.xlu1 %278 }
 0x268   :  { %v281_v48 = vmul.f32 %v279_v47, %v264_v22 }
 0x26a   :  { %353 = vrot.lane.b32.xlu1 %v281_v48, %s3156_s27 }
 0x2dc   :  { %v354_v55 = vpop.permute.xlu1 %353 }
 0x2dd   :  { %2602 = vmatmul.mubr.msk.f32.vlgmr.msra.gmra.mrb[2].mxu1 %vm188_vm2, %v354_v55  ;;  %2613 = vmatmul.mubr.msk.f32.vlgmr.msra.gmra.mrb[8].mxu0 %vm188_vm2, %v354_v55 }
 0x2de   :  { %2876 = vmatpush3.bf16.msra.mxu0 %v3225_v31  ;;  %2888 = vmatpush3.bf16.msra.mxu1 %v3191_v8 }
 0x2df   :  { %2877 = vmatprep.subr.bf16.mxu0 %v3152_v0  ;;  %2889 = vmatprep.subr.bf16.mxu1 %v3152_v0 }
 0x2e0   :  { %2623 = vmatprep.mubr.msk.f32.mxu0 %vm3153_vm0, %v3154_v1  ;;  %2645 = vmatprep.mubr.msk.f32.mxu1 %vm3153_vm0, %v3154_v1 }
 0x2e2   :  { %2879 = vmatpush3.bf16.msra.mxu0 %v3236_v36  ;;  %2891 = vmatpush3.bf16.msra.mxu1 %v3198_v12 }
 0x2e3   :  { %2880 = vmatprep.subr.bf16.mxu0 %v3152_v0  ;;  %2892 = vmatprep.subr.bf16.mxu1 %v3152_v0 }
 0x3b0   :  { %v423_v58 = vpop.f32.mrb[2].mxu1  ;;  %v514_v59 = vpop.f32.mrb[8].mxu0 }
 0x3b1   :  { %v3000_v60 = vadd.f32 %v3295_v56, %v423_v58  ;;  %v515_v61 = vadd.f32 %v514_v59, %v150_v57  ;;  %v2603_v62 = vpop.f32.mrb[3].mxu1  ;;  %v2614_v63 = vpop.f32.mrb[9].mxu0 }
 0x3b3   :  { %3037 = vtanh.f32 %v3000_v60 }
 0x3b4   :  { %3039 = vtanh.f32 %v515_v61 }
 0x3bd   :  { %v3038_v2 = vpop.eup %3037 }
 0x3be   :  { %v3040_v3 = vpop.eup %3039  ;;  %432 = vrot.lane.b32.xlu0 %v3038_v2, %s3155_s26  ;;  %v428_v4 = vmul.f32 0.5, %v3038_v2 }
 0x3bf   :  { %523 = vrot.lane.b32.xlu1 %v3040_v3, %s3155_s26  ;;  %v519_v5 = vmul.f32 0.5, %v3040_v3 }
 0x3c0   :  { %v429_v6 = vadd.f32 0.5, %v428_v4 }
 0x3c1   :  { %v520_v7 = vadd.f32 0.5, %v519_v5 }
 0x3c2   :  { %v430_v15 = vmul.f32 0.0, %v429_v6 }
 0x3c3   :  { %v521_v16 = vmul.f32 %v520_v7, %v3219_v27 }
 0x430   :  { %v433_v9 = vpop.permute.xlu0 %432 }
 0x431   :  { %v524_v10 = vpop.permute.xlu1 %523  ;;  %v435_v11 = vmul.f32 %v433_v9, %v429_v6  ;;  %v160_v9 = vadd.f32 %v3269_v49, %v3212_v13 }
 0x432   :  { %v526_v14 = vmul.f32 %v524_v10, %v520_v7 }
 0x433   :  { %437 = vrot.lane.b32.xlu0 %v435_v11, %s3156_s27 }
 0x434   :  { %528 = vrot.lane.b32.xlu1 %v526_v14, %s3156_s27 }
 0x4a5   :  { %v438_v17 = vpop.permute.xlu0 %437 }
 0x4a6   :  { %v529_v18 = vpop.permute.xlu1 %528  ;;  %v440_v19 = vadd.f32 %v438_v17, %v430_v15 }
 0x4a7   :  { %v531_v20 = vadd.f32 %v529_v18, %v521_v16 }
 0x4a8   :  { %3041 = vtanh.f32 %v440_v19 }
 0x4a9   :  { %3043 = vtanh.f32 %v531_v20 }
 0x4b2   :  { %v3042_v21 = vpop.eup %3041 }
 0x4b3   :  { %v3044_v22 = vpop.eup %3043  ;;  %443 = vrot.lane.b32.xlu0 %v3042_v21, %s3155_s26 }
 0x4b4   :  { %534 = vrot.lane.b32.xlu1 %v3044_v22, %s3155_s26 }
 0x525   :  { %v444_v23 = vpop.permute.xlu0 %443 }
 0x526   :  { %v535_v24 = vpop.permute.xlu1 %534  ;;  %v3307_v25 = vmul.f32 %v444_v23, %v429_v6 }
 0x527   :  { %v537_v26 = vmul.f32 %v535_v24, %v520_v7 }
 0x528   :  { %539 = vrot.lane.b32.xlu0 %v3307_v25, %s3156_s27 }
 0x529   :  { %614 = vrot.lane.b32.xlu1 %v537_v26, %s3156_s27 }
 0x59a   :  { %v540_v27 = vpop.permute.xlu0 %539 }
 0x59b   :  { %v615_v28 = vpop.permute.xlu1 %614  ;;  %2624 = vmatmul.mubr.msk.f32.vlgmr.msra.gmra.mrb[10].mxu0 %vm188_vm2, %v540_v27 }
 0x59c   :  { %2882 = vmatpush3.bf16.msra.mxu0 %v3248_v41  ;;  %2646 = vmatmul.mubr.msk.f32.vlgmr.msra.gmra.mrb[4].mxu1 %vm188_vm2, %v615_v28 }
 0x59d   :  { %2883 = vmatprep.subr.bf16.mxu0 %v3152_v0  ;;  %2634 = vmatprep.mubr.msk.f32.mxu0 %vm3153_vm0, %v3154_v1 }
 0x59e   :  { %2894 = vmatpush3.bf16.msra.mxu1 %v3225_v31  ;;  %2656 = vmatprep.mubr.msk.f32.mxu1 %vm3153_vm0, %v3154_v1 }
 0x59f   :  { %2895 = vmatprep.subr.bf16.mxu1 %v3152_v0 }
 0x5a0   :  { %2885 = vmatpush3.bf16.msra.mxu0 %v3259_v46 }
 0x5a1   :  { %2904 = vmatprep.subr.bf16.mxu0 %v3152_v0 }
 0x5a2   :  { %2897 = vmatpush3.bf16.msra.mxu1 %v3236_v36 }
 0x5a3   :  { %2635 = vmatmul.mubr.msk.f32.vlgmr.msra.gmra.mrb[10].mxu0 %vm188_vm2, %v615_v28  ;;  %2898 = vmatprep.subr.bf16.mxu1 %v3152_v0 }
 0x5a4   :  { %2906 = vmatpush3.bf16.msra.mxu0 %v3191_v8  ;;  %2678 = vmatprep.mubr.msk.f32.mxu0 %vm3153_vm0, %v3154_v1 }
 0x5a5   :  { %2907 = vmatprep.subr.bf16.mxu0 %v3152_v0 }
 0x5a8   :  { %2909 = vmatpush3.bf16.msra.mxu0 %v3198_v12 }
 0x5a9   :  { %2910 = vmatprep.subr.bf16.mxu0 %v3152_v0 }
 0x66f   :  { %v775_v30 = vpop.f32.mrb[4].mxu1 }
 0x670   :  { %v776_v32 = vadd.f32 %v775_v30, %v155_v29  ;;  %v2647_v33 = vpop.f32.mrb[5].mxu1 }
 0x672   :  { %3045 = vtanh.f32 %v776_v32 }
 0x676   :  { %v684_v34 = vpop.f32.mrb[10].mxu0 }
 0x677   :  { %v3001_v35 = vadd.f32 %v3295_v56, %v684_v34  ;;  %v2636_v37 = vpop.f32.mrb[11].mxu0 }
 0x679   :  { %3047 = vtanh.f32 %v3001_v35 }
 0x67c   :  { %v3046_v38 = vpop.eup %3045 }
 0x67d   :  { %784 = vrot.lane.b32.xlu1 %v3046_v38, %s3155_s26  ;;  %v780_v40 = vmul.f32 0.5, %v3046_v38 }
 0x67f   :  { %v781_v42 = vadd.f32 0.5, %v780_v40 }
 0x681   :  { %v782_v55 = vmul.f32 %v781_v42, %v531_v20 }
 0x683   :  { %v3048_v39 = vpop.eup %3047 }
 0x684   :  { %693 = vrot.lane.b32.xlu0 %v3048_v39, %s3155_s26  ;;  %v689_v45 = vmul.f32 0.5, %v3048_v39 }
 0x686   :  { %v690_v47 = vadd.f32 0.5, %v689_v45 }
 0x688   :  { %v691_v59 = vmul.f32 %v690_v47, %v440_v19 }
 0x6ef   :  { %v785_v43 = vpop.permute.xlu1 %784 }
 0x6f0   :  { %v787_v44 = vmul.f32 %v785_v43, %v781_v42 }
 0x6f2   :  { %789 = vrot.lane.b32.xlu1 %v787_v44, %s3156_s27 }
 0x6f6   :  { %v694_v48 = vpop.permute.xlu0 %693 }
 0x6f7   :  { %v696_v50 = vmul.f32 %v694_v48, %v690_v47 }
 0x6f9   :  { %698 = vrot.lane.b32.xlu0 %v696_v50, %s3156_s27 }
 0x764   :  { %v790_v57 = vpop.permute.xlu1 %789 }
 0x765   :  { %v792_v58 = vadd.f32 %v790_v57, %v782_v55 }
 0x767   :  { %3049 = vtanh.f32 %v792_v58 }
 0x76b   :  { %v699_v60 = vpop.permute.xlu0 %698 }
 0x76c   :  { %v701_v61 = vadd.f32 %v699_v60, %v691_v59 }
 0x76e   :  { %3051 = vtanh.f32 %v701_v61 }
 0x771   :  { %v3050_v62 = vpop.eup %3049 }
 0x772   :  { %795 = vrot.lane.b32.xlu1 %v3050_v62, %s3155_s26 }
 0x778   :  { %v3052_v63 = vpop.eup %3051 }
 0x779   :  { %704 = vrot.lane.b32.xlu0 %v3052_v63, %s3155_s26 }
 0x7e4   :  { %v796_v2 = vpop.permute.xlu1 %795 }
 0x7e5   :  { %v798_v3 = vmul.f32 %v796_v2, %v781_v42 }
 0x7e7   :  { %875 = vrot.lane.b32.xlu1 %v798_v3, %s3156_s27 }
 0x7eb   :  { %v705_v4 = vpop.permute.xlu0 %704 }
 0x7ec   :  { %v707_v5 = vmul.f32 %v705_v4, %v690_v47 }
 0x7ee   :  { %800 = vrot.lane.b32.xlu0 %v707_v5, %s3156_s27  ;;  %v708_v42 = vadd.f32 %v707_v5, %v3307_v25  ;;  %v165_v25 = vadd.f32 %v3212_v13, %v3275_v52 }
 0x859   :  { %v876_v6 = vpop.permute.xlu1 %875 }
 0x85a   :  { %2679 = vmatmul.mubr.msk.f32.vlgmr.msra.gmra.mrb[12].mxu0 %vm188_vm2, %v876_v6 }
 0x85b   :  { %2912 = vmatpush3.bf16.msra.mxu0 %v3225_v31  ;;  %2689 = vmatprep.mubr.msk.f32.mxu0 %vm3153_vm0, %v3154_v1 }
 0x85c   :  { %2913 = vmatprep.subr.bf16.mxu0 %v3152_v0 }
 0x85f   :  { %2915 = vmatpush3.bf16.msra.mxu0 %v3236_v36 }
 0x860   :  { %v801_v7 = vpop.permute.xlu0 %800  ;;  %2916 = vmatprep.subr.bf16.mxu0 %v3152_v0 }
 0x861   :  { %2657 = vmatmul.mubr.msk.f32.vlgmr.msra.gmra.mrb[6].mxu1 %vm188_vm2, %v801_v7 }
 0x862   :  { %2900 = vmatpush3.bf16.msra.mxu1 %v3248_v41  ;;  %2667 = vmatprep.mubr.msk.f32.mxu1 %vm3153_vm0, %v3154_v1 }
 0x863   :  { %2901 = vmatprep.subr.bf16.mxu1 %v3152_v0 }
 0x866   :  { %2903 = vmatpush3.bf16.msra.mxu1 %v3259_v46 }
 0x867   :  { %2922 = vmatprep.subr.bf16.mxu1 %v3152_v0 }
 0x869   :  { %2668 = vmatmul.mubr.msk.f32.vlgmr.msra.gmra.mrb[6].mxu1 %vm188_vm2, %v876_v6 }
 0x86a   :  { %2924 = vmatpush3.bf16.msra.mxu1 %v3191_v8  ;;  %2711 = vmatprep.mubr.msk.f32.mxu1 %vm3153_vm0, %v3154_v1 }
 0x86b   :  { %2925 = vmatprep.subr.bf16.mxu1 %v3152_v0 }
 0x86e   :  { %2927 = vmatpush3.bf16.msra.mxu1 %v3198_v12 }
 0x86f   :  { %2928 = vmatprep.subr.bf16.mxu1 %v3152_v0 }
 0x92d   :  { %v1036_v10 = vpop.f32.mrb[12].mxu0 }
 0x92e   :  { %v1037_v11 = vadd.f32 %v1036_v10, %v160_v9  ;;  %v2680_v14 = vpop.f32.mrb[13].mxu0 }
 0x930   :  { %3053 = vtanh.f32 %v1037_v11 }
 0x93a   :  { %v3054_v15 = vpop.eup %3053 }
 0x93b   :  { %1045 = vrot.lane.b32.xlu1 %v3054_v15, %s3155_s26  ;;  %v1041_v20 = vmul.f32 0.5, %v3054_v15 }
 0x93c   :  { %v945_v16 = vpop.f32.mrb[6].mxu1 }
 0x93d   :  { %v3002_v17 = vadd.f32 %v3295_v56, %v945_v16  ;;  %v2669_v18 = vpop.f32.mrb[7].mxu1  ;;  %v1042_v21 = vadd.f32 0.5, %v1041_v20 }
 0x93f   :  { %3055 = vtanh.f32 %v3002_v17  ;;  %v1043_v28 = vmul.f32 %v1042_v21, %v792_v58 }
 0x949   :  { %v3056_v19 = vpop.eup %3055 }
 0x94a   :  { %954 = vrot.lane.b32.xlu0 %v3056_v19, %s3155_s26  ;;  %v950_v49 = vmul.f32 0.5, %v3056_v19 }
 0x94c   :  { %v951_v24 = vadd.f32 0.5, %v950_v49 }
 0x94e   :  { %v952_v33 = vmul.f32 %v951_v24, %v701_v61 }
 0x9ad   :  { %v1046_v22 = vpop.permute.xlu1 %1045 }
 0x9ae   :  { %v1048_v23 = vmul.f32 %v1046_v22, %v1042_v21 }
 0x9b0   :  { %1050 = vrot.lane.b32.xlu1 %v1048_v23, %s3156_s27 }
 0x9bc   :  { %v955_v26 = vpop.permute.xlu0 %954 }
 0x9bd   :  { %v957_v27 = vmul.f32 %v955_v26, %v951_v24 }
 0x9bf   :  { %959 = vrot.lane.b32.xlu0 %v957_v27, %s3156_s27 }
 0xa22   :  { %v1051_v29 = vpop.permute.xlu1 %1050 }
 0xa23   :  { %v1053_v30 = vadd.f32 %v1051_v29, %v1043_v28 }
 0xa25   :  { %3057 = vtanh.f32 %v1053_v30 }
 0xa2f   :  { %v3058_v32 = vpop.eup %3057 }
 0xa30   :  { %1056 = vrot.lane.b32.xlu1 %v3058_v32, %s3155_s26 }
 0xa31   :  { %v960_v34 = vpop.permute.xlu0 %959 }
 0xa32   :  { %v962_v35 = vadd.f32 %v960_v34, %v952_v33 }
 0xa34   :  { %3059 = vtanh.f32 %v962_v35 }
 0xa3e   :  { %v3060_v37 = vpop.eup %3059 }
 0xa3f   :  { %965 = vrot.lane.b32.xlu0 %v3060_v37, %s3155_s26 }
 0xaa2   :  { %v1057_v38 = vpop.permute.xlu1 %1056 }
 0xaa3   :  { %v1059_v39 = vmul.f32 %v1057_v38, %v1042_v21 }
 0xaa5   :  { %1136 = vrot.lane.b32.xlu1 %v1059_v39, %s3156_s27 }
 0xab1   :  { %v966_v40 = vpop.permute.xlu0 %965 }
 0xab2   :  { %v968_v43 = vmul.f32 %v966_v40, %v951_v24  ;;  %v170_v24 = vadd.f32 %v3273_v51, %v3212_v13 }
 0xab4   :  { %v969_v44 = vadd.f32 %v968_v43, %v708_v42  ;;  %1061 = vrot.lane.b32.xlu0 %v968_v43, %s3156_s27 }
 0xb17   :  { %v1137_v45 = vpop.permute.xlu1 %1136 }
 0xb18   :  { %2712 = vmatmul.mubr.msk.f32.vlgmr.msra.gmra.mrb[8].mxu1 %vm188_vm2, %v1137_v45 }
 0xb19   :  { %2930 = vmatpush3.bf16.msra.mxu1 %v3225_v31  ;;  %2722 = vmatprep.mubr.msk.f32.mxu1 %vm3153_vm0, %v3154_v1 }
 0xb1a   :  { %2931 = vmatprep.subr.bf16.mxu1 %v3152_v0 }
 0xb1d   :  { %2933 = vmatpush3.bf16.msra.mxu1 %v3236_v36 }
 0xb1e   :  { %2934 = vmatprep.subr.bf16.mxu1 %v3152_v0 }
 0xb26   :  { %v1062_v47 = vpop.permute.xlu0 %1061 }
 0xb27   :  { %2690 = vmatmul.mubr.msk.f32.vlgmr.msra.gmra.mrb[14].mxu0 %vm188_vm2, %v1062_v47 }
 0xb28   :  { %2918 = vmatpush3.bf16.msra.mxu0 %v3248_v41  ;;  %2700 = vmatprep.mubr.msk.f32.mxu0 %vm3153_vm0, %v3154_v1 }
 0xb29   :  { %2919 = vmatprep.subr.bf16.mxu0 %v3152_v0 }
 0xb2c   :  { %2921 = vmatpush3.bf16.msra.mxu0 %v3259_v46 }
 0xb2d   :  { %2940 = vmatprep.subr.bf16.mxu0 %v3152_v0 }
 0xb2f   :  { %2701 = vmatmul.mubr.msk.f32.vlgmr.msra.gmra.mrb[14].mxu0 %vm188_vm2, %v1137_v45 }
 0xb30   :  { %2942 = vmatpush3.bf16.msra.mxu0 %v3191_v8  ;;  %2744 = vmatprep.mubr.msk.f32.mxu0 %vm3153_vm0, %v3154_v1 }
 0xb31   :  { %2943 = vmatprep.subr.bf16.mxu0 %v3152_v0 }
 0xb34   :  { %2945 = vmatpush3.bf16.msra.mxu0 %v3198_v12 }
 0xb35   :  { %2946 = vmatprep.subr.bf16.mxu0 %v3152_v0 }
 0xbeb   :  { %v1297_v48 = vpop.f32.mrb[8].mxu1 }
 0xbec   :  { %v1298_v50 = vadd.f32 %v1297_v48, %v165_v25  ;;  %v2713_v55 = vpop.f32.mrb[9].mxu1 }
 0xbee   :  { %3061 = vtanh.f32 %v1298_v50 }
 0xbf8   :  { %v3062_v57 = vpop.eup %3061 }
 0xbf9   :  { %1306 = vrot.lane.b32.xlu1 %v3062_v57, %s3155_s26  ;;  %v1302_v62 = vmul.f32 0.5, %v3062_v57 }
 0xbfb   :  { %v1303_v63 = vadd.f32 0.5, %v1302_v62 }
 0xbfd   :  { %v1304_v7 = vmul.f32 %v1303_v63, %v1053_v30 }
 0xc02   :  { %v1206_v58 = vpop.f32.mrb[14].mxu0 }
 0xc03   :  { %v3003_v59 = vadd.f32 %v3295_v56, %v1206_v58  ;;  %v2702_v60 = vpop.f32.mrb[15].mxu0 }
 0xc05   :  { %3063 = vtanh.f32 %v3003_v59 }
 0xc0f   :  { %v3064_v61 = vpop.eup %3063 }
 0xc10   :  { %1215 = vrot.lane.b32.xlu0 %v3064_v61, %s3155_s26  ;;  %v1211_v52 = vmul.f32 0.5, %v3064_v61 }
 0xc12   :  { %v1212_v4 = vadd.f32 0.5, %v1211_v52 }
 0xc14   :  { %v1213_v14 = vmul.f32 %v1212_v4, %v962_v35 }
 0xc6b   :  { %v1307_v2 = vpop.permute.xlu1 %1306 }
 0xc6c   :  { %v1309_v3 = vmul.f32 %v1307_v2, %v1303_v63 }
 0xc6e   :  { %1311 = vrot.lane.b32.xlu1 %v1309_v3, %s3156_s27  ;;  %v175_v3 = vadd.f32 %v3212_v13, %v3279_v54 }
 0xc82   :  { %v1216_v5 = vpop.permute.xlu0 %1215 }
 0xc83   :  { %v1218_v6 = vmul.f32 %v1216_v5, %v1212_v4 }
 0xc85   :  { %1220 = vrot.lane.b32.xlu0 %v1218_v6, %s3156_s27 }
 0xce0   :  { %v1312_v9 = vpop.permute.xlu1 %1311 }
 0xce1   :  { %v1314_v10 = vadd.f32 %v1312_v9, %v1304_v7 }
 0xce3   :  { %3065 = vtanh.f32 %v1314_v10 }
 0xced   :  { %v3066_v11 = vpop.eup %3065 }
 0xcee   :  { %1317 = vrot.lane.b32.xlu1 %v3066_v11, %s3155_s26 }
 0xcf7   :  { %v1221_v15 = vpop.permute.xlu0 %1220 }
 0xcf8   :  { %v1223_v16 = vadd.f32 %v1221_v15, %v1213_v14 }
 0xcfa   :  { %3067 = vtanh.f32 %v1223_v16 }
 0xd04   :  { %v3068_v17 = vpop.eup %3067 }
 0xd05   :  { %1226 = vrot.lane.b32.xlu0 %v3068_v17, %s3155_s26 }
 0xd60   :  { %v1318_v18 = vpop.permute.xlu1 %1317 }
 0xd61   :  { %v1320_v19 = vmul.f32 %v1318_v18, %v1303_v63 }
 0xd63   :  { %1397 = vrot.lane.b32.xlu1 %v1320_v19, %s3156_s27 }
 0xd77   :  { %v1227_v20 = vpop.permute.xlu0 %1226 }
 0xd78   :  { %v1229_v21 = vmul.f32 %v1227_v20, %v1212_v4 }
 0xd7a   :  { %v1230_v22 = vadd.f32 %v1229_v21, %v969_v44  ;;  %1322 = vrot.lane.b32.xlu0 %v1229_v21, %s3156_s27 }
 0xdd5   :  { %v1398_v23 = vpop.permute.xlu1 %1397 }
 0xdd6   :  { %2745 = vmatmul.mubr.msk.f32.vlgmr.msra.gmra.mrb[16].mxu0 %vm188_vm2, %v1398_v23 }
 0xdd7   :  { %2948 = vmatpush3.bf16.msra.mxu0 %v3225_v31  ;;  %2755 = vmatprep.mubr.msk.f32.mxu0 %vm3153_vm0, %v3154_v1 }
 0xdd8   :  { %2949 = vmatprep.subr.bf16.mxu0 %v3152_v0 }
 0xddb   :  { %2951 = vmatpush3.bf16.msra.mxu0 %v3236_v36 }
 0xddc   :  { %2952 = vmatprep.subr.bf16.mxu0 %v3152_v0 }
 0xdec   :  { %v1323_v49 = vpop.permute.xlu0 %1322 }
 0xded   :  { %2723 = vmatmul.mubr.msk.f32.vlgmr.msra.gmra.mrb[10].mxu1 %vm188_vm2, %v1323_v49 }
 0xdee   :  { %2936 = vmatpush3.bf16.msra.mxu1 %v3248_v41  ;;  %2733 = vmatprep.mubr.msk.f32.mxu1 %vm3153_vm0, %v3154_v1 }
 0xdef   :  { %2937 = vmatprep.subr.bf16.mxu1 %v3152_v0 }
 0xdf2   :  { %2939 = vmatpush3.bf16.msra.mxu1 %v3259_v46 }
 0xdf3   :  { %2958 = vmatprep.subr.bf16.mxu1 %v3152_v0 }
 0xdf5   :  { %2734 = vmatmul.mubr.msk.f32.vlgmr.msra.gmra.mrb[10].mxu1 %vm188_vm2, %v1398_v23 }
 0xdf6   :  { %2960 = vmatpush3.bf16.msra.mxu1 %v3191_v8  ;;  %2777 = vmatprep.mubr.msk.f32.mxu1 %vm3153_vm0, %v3154_v1 }
 0xdf7   :  { %2961 = vmatprep.subr.bf16.mxu1 %v3152_v0 }
 0xdfa   :  { %2963 = vmatpush3.bf16.msra.mxu1 %v3198_v12 }
 0xdfb   :  { %2964 = vmatprep.subr.bf16.mxu1 %v3152_v0 }
 0xea9   :  { %v1558_v26 = vpop.f32.mrb[16].mxu0 }
 0xeaa   :  { %v1559_v27 = vadd.f32 %v1558_v26, %v170_v24  ;;  %v2746_v28 = vpop.f32.mrb[17].mxu0 }
 0xeac   :  { %3069 = vtanh.f32 %v1559_v27 }
 0xeb6   :  { %v3070_v29 = vpop.eup %3069 }
 0xeb7   :  { %1567 = vrot.lane.b32.xlu1 %v3070_v29, %s3155_s26  ;;  %v1563_v35 = vmul.f32 0.5, %v3070_v29 }
 0xeb9   :  { %v1564_v37 = vadd.f32 0.5, %v1563_v35 }
 0xebb   :  { %v1565_v44 = vmul.f32 %v1564_v37, %v1314_v10 }
 0xec8   :  { %v1467_v30 = vpop.f32.mrb[10].mxu1 }
 0xec9   :  { %v3004_v32 = vadd.f32 %v3295_v56, %v1467_v30  ;;  %v2735_v33 = vpop.f32.mrb[11].mxu1 }
 0xecb   :  { %3071 = vtanh.f32 %v3004_v32 }
 0xed5   :  { %v3072_v34 = vpop.eup %3071 }
 0xed6   :  { %1476 = vrot.lane.b32.xlu0 %v3072_v34, %s3155_s26  ;;  %v1472_v51 = vmul.f32 0.5, %v3072_v34 }
 0xed8   :  { %v1473_v40 = vadd.f32 0.5, %v1472_v51 }
 0xeda   :  { %v1474_v48 = vmul.f32 %v1473_v40, %v1223_v16 }
 0xf29   :  { %v1568_v38 = vpop.permute.xlu1 %1567 }
 0xf2a   :  { %v1570_v39 = vmul.f32 %v1568_v38, %v1564_v37 }
 0xf2c   :  { %1572 = vrot.lane.b32.xlu1 %v1570_v39, %s3156_s27 }
 0xf48   :  { %v1477_v42 = vpop.permute.xlu0 %1476 }
 0xf49   :  { %v1479_v43 = vmul.f32 %v1477_v42, %v1473_v40 }
 0xf4b   :  { %1481 = vrot.lane.b32.xlu0 %v1479_v43, %s3156_s27 }
 0xf9e   :  { %v1573_v45 = vpop.permute.xlu1 %1572 }
 0xf9f   :  { %v1575_v47 = vadd.f32 %v1573_v45, %v1565_v44 }
 0xfa1   :  { %3073 = vtanh.f32 %v1575_v47 }
 0xfab   :  { %v3074_v25 = vpop.eup %3073 }
 0xfac   :  { %1578 = vrot.lane.b32.xlu1 %v3074_v25, %s3155_s26 }
 0xfbd   :  { %v1482_v50 = vpop.permute.xlu0 %1481 }
 0xfbe   :  { %v1484_v55 = vadd.f32 %v1482_v50, %v1474_v48 }
 0xfc0   :  { %3075 = vtanh.f32 %v1484_v55 }
 0xfca   :  { %v3076_v57 = vpop.eup %3075 }
 0xfcb   :  { %1487 = vrot.lane.b32.xlu0 %v3076_v57, %s3155_s26 }
0x101e   :  { %v1579_v58 = vpop.permute.xlu1 %1578 }
0x101f   :  { %v1581_v59 = vmul.f32 %v1579_v58, %v1564_v37 }
0x1021   :  { %1658 = vrot.lane.b32.xlu1 %v1581_v59, %s3156_s27 }
0x103d   :  { %v1488_v60 = vpop.permute.xlu0 %1487 }
0x103e   :  { %v1490_v61 = vmul.f32 %v1488_v60, %v1473_v40 }
0x1040   :  { %v1491_v62 = vadd.f32 %v1490_v61, %v1230_v22  ;;  %1583 = vrot.lane.b32.xlu0 %v1490_v61, %s3156_s27 }
0x1093   :  { %v1659_v63 = vpop.permute.xlu1 %1658 }
0x1094   :  { %2778 = vmatmul.mubr.msk.f32.vlgmr.msra.gmra.mrb[12].mxu1 %vm188_vm2, %v1659_v63 }
0x1095   :  { %2966 = vmatpush3.bf16.msra.mxu1 %v3225_v31  ;;  %2788 = vmatprep.mubr.msk.f32.mxu1 %vm3153_vm0, %v3154_v1 }
0x1096   :  { %2967 = vmatprep.subr.bf16.mxu1 %v3152_v0 }
0x1099   :  { %2969 = vmatpush3.bf16.msra.mxu1 %v3236_v36 }
0x109a   :  { %2970 = vmatprep.subr.bf16.mxu1 %v3152_v0 }
0x10b2   :  { %v1584_v2 = vpop.permute.xlu0 %1583 }
0x10b3   :  { %2756 = vmatmul.mubr.msk.f32.vlgmr.msra.gmra.mrb[18].mxu0 %vm188_vm2, %v1584_v2 }
0x10b4   :  { %2954 = vmatpush3.bf16.msra.mxu0 %v3248_v41  ;;  %2766 = vmatprep.mubr.msk.f32.mxu0 %vm3153_vm0, %v3154_v1 }
0x10b5   :  { %2955 = vmatprep.subr.bf16.mxu0 %v3152_v0 }
0x10b8   :  { %2957 = vmatpush3.bf16.msra.mxu0 %v3259_v46 }
0x10b9   :  { %2976 = vmatprep.subr.bf16.mxu0 %v3152_v0 }
0x10bb   :  { %2767 = vmatmul.mubr.msk.f32.vlgmr.msra.gmra.mrb[18].mxu0 %vm188_vm2, %v1659_v63 }
0x10bc   :  { %2978 = vmatpush3.bf16.msra.mxu0 %v3191_v8  ;;  %2810 = vmatprep.mubr.msk.f32.mxu0 %vm3153_vm0, %v3154_v1 }
0x10bd   :  { %2979 = vmatprep.subr.bf16.mxu0 %v3152_v0 }
0x10c0   :  { %2981 = vmatpush3.bf16.msra.mxu0 %v3198_v12 }
0x10c1   :  { %2982 = vmatprep.subr.bf16.mxu0 %v3152_v0 }
0x1167   :  { %v1819_v52 = vpop.f32.mrb[12].mxu1 }
0x1168   :  { %v1820_v4 = vadd.f32 %v1819_v52, %v175_v3  ;;  %v2779_v5 = vpop.f32.mrb[13].mxu1 }
0x116a   :  { %3077 = vtanh.f32 %v1820_v4 }
0x1174   :  { %v3078_v6 = vpop.eup %3077 }
0x1175   :  { %1828 = vrot.lane.b32.xlu1 %v3078_v6, %s3155_s26  ;;  %v1824_v12 = vmul.f32 0.5, %v3078_v6 }
0x1177   :  { %v1825_v11 = vadd.f32 0.5, %v1824_v12 }
0x1179   :  { %v1826_v19 = vmul.f32 %v1825_v11, %v1575_v47 }
0x118e   :  { %v1728_v8 = vpop.f32.mrb[18].mxu0 }
0x118f   :  { %v3005_v7 = vadd.f32 %v3295_v56, %v1728_v8  ;;  %v2768_v9 = vpop.f32.mrb[19].mxu0 }
0x1191   :  { %3079 = vtanh.f32 %v3005_v7 }
0x119b   :  { %v3080_v10 = vpop.eup %3079 }
0x119c   :  { %1737 = vrot.lane.b32.xlu0 %v3080_v10, %s3155_s26  ;;  %v1733_v54 = vmul.f32 0.5, %v3080_v10 }
0x119e   :  { %v1734_v16 = vadd.f32 0.5, %v1733_v54  ;;  %v2276_v54 = vld [vmem:[#allocation2 + $0x80] sm:$0xff] }
0x11a0   :  { %v1735_v23 = vmul.f32 %v1734_v16, %v1484_v55 }
0x11e7   :  { %v1829_v14 = vpop.permute.xlu1 %1828 }
0x11e8   :  { %v1831_v15 = vmul.f32 %v1829_v14, %v1825_v11 }
0x11ea   :  { %1833 = vrot.lane.b32.xlu1 %v1831_v15, %s3156_s27 }
0x120e   :  { %v1738_v17 = vpop.permute.xlu0 %1737 }
0x120f   :  { %v1740_v18 = vmul.f32 %v1738_v17, %v1734_v16  ;;  %v2278_v17 = vld [vmem:[#allocation2 + $0x90] sm:$0xff] }
0x1211   :  { %1742 = vrot.lane.b32.xlu0 %v1740_v18, %s3156_s27 }
0x125c   :  { %v1834_v20 = vpop.permute.xlu1 %1833 }
0x125d   :  { %v1836_v21 = vadd.f32 %v1834_v20, %v1826_v19 }
0x125f   :  { %3081 = vtanh.f32 %v1836_v21 }
0x1269   :  { %v3082_v22 = vpop.eup %3081 }
0x126a   :  { %1839 = vrot.lane.b32.xlu1 %v3082_v22, %s3155_s26 }
0x1283   :  { %v1743_v49 = vpop.permute.xlu0 %1742 }
0x1284   :  { %v1745_v24 = vadd.f32 %v1743_v49, %v1735_v23 }
0x1286   :  { %3083 = vtanh.f32 %v1745_v24 }
0x1290   :  { %v3084_v26 = vpop.eup %3083 }
0x1291   :  { %1748 = vrot.lane.b32.xlu0 %v3084_v26, %s3155_s26  ;;  %v2418_v26 = vld [vmem:[#allocation2 + $0xa0] ss:$0 sm:$0xff] }
0x12dc   :  { %v1840_v27 = vpop.permute.xlu1 %1839 }
0x12dd   :  { %v1842_v28 = vmul.f32 %v1840_v27, %v1825_v11 }
0x12df   :  { %1919 = vrot.lane.b32.xlu1 %v1842_v28, %s3156_s27 }
0x1303   :  { %v1749_v29 = vpop.permute.xlu0 %1748 }
0x1304   :  { %v1751_v30 = vmul.f32 %v1749_v29, %v1734_v16  ;;  %v2277_v16 = vld [vmem:[#allocation2 + $0x88] sm:$0xff] }
0x1305   :  { %v2995_v18 = vpack.c.bf16 %v2277_v16, %v2276_v54 }
0x1306   :  { %v1752_v32 = vadd.f32 %v1751_v30, %v1491_v62  ;;  %1844 = vrot.lane.b32.xlu0 %v1751_v30, %s3156_s27 }
0x1351   :  { %v1920_v33 = vpop.permute.xlu1 %1919 }
0x1352   :  { %2811 = vmatmul.mubr.msk.f32.vlgmr.msra.gmra.mrb[20].mxu0 %vm188_vm2, %v1920_v33 }
0x1353   :  { %2984 = vmatpush3.bf16.msra.mxu0 %v3225_v31  ;;  %2821 = vmatprep.mubr.msk.f32.mxu0 %vm3153_vm0, %v3154_v1  ;;  %v180_v31 = vadd.f32 %v3277_v53, %v3212_v13 }
0x1354   :  { %2985 = vmatprep.subr.bf16.mxu0 %v3152_v0 }
0x1357   :  { %2987 = vmatpush3.bf16.msra.mxu0 %v3236_v36 }
0x1358   :  { %2988 = vmatprep.subr.bf16.mxu0 %v3152_v0 }
0x1378   :  { %v1845_v34 = vpop.permute.xlu0 %1844 }
0x1379   :  { %2789 = vmatmul.mubr.msk.f32.vlgmr.msra.gmra.mrb[14].mxu1 %vm188_vm2, %v1845_v34 }
0x137a   :  { %2972 = vmatpush3.bf16.msra.mxu1 %v3248_v41  ;;  %2799 = vmatprep.mubr.msk.f32.mxu1 %vm3153_vm0, %v3154_v1 }
0x137b   :  { %2973 = vmatprep.subr.bf16.mxu1 %v3152_v0 }
0x137e   :  { %2975 = vmatpush3.bf16.msra.mxu1 %v3259_v46 }
0x137f   :  { %2994 = vmatprep.subr.bf16.mxu1 %v3152_v0 }
0x1381   :  { %2800 = vmatmul.mubr.msk.f32.vlgmr.msra.gmra.mrb[14].mxu1 %vm188_vm2, %v1920_v33 }
0x1382   :  { %2843 = vmatprep.mubr.msk.f32.mxu1 %vm3153_vm0, %v3154_v1  ;;  %2996 = vmatpush3.bf16.msra.mxu1 %v2995_v18 }
0x1383   :  { %2997 = vmatprep.subr.bf16.mxu1 %v3152_v0 }
0x1425   :  { %v2080_v36 = vpop.f32.mrb[20].mxu0 }
0x1426   :  { %v2081_v35 = vadd.f32 %v2080_v36, %v180_v31  ;;  %v2812_v37 = vpop.f32.mrb[21].mxu0 }
0x1428   :  { %3085 = vtanh.f32 %v2081_v35 }
0x1432   :  { %v3086_v38 = vpop.eup %3085 }
0x1433   :  { %2089 = vrot.lane.b32.xlu1 %v3086_v38, %s3155_s26  ;;  %v2085_v43 = vmul.f32 0.5, %v3086_v38 }
0x1435   :  { %v2086_v44 = vadd.f32 0.5, %v2085_v43 }
0x1437   :  { %v2087_v50 = vmul.f32 %v2086_v44, %v1836_v21 }
0x1454   :  { %v1989_v39 = vpop.f32.mrb[14].mxu1 }
0x1455   :  { %v3006_v51 = vadd.f32 %v3295_v56, %v1989_v39  ;;  %v2801_v40 = vpop.f32.mrb[15].mxu1 }
0x1457   :  { %3087 = vtanh.f32 %v3006_v51 }
0x1461   :  { %v3088_v42 = vpop.eup %3087 }
0x1462   :  { %1998 = vrot.lane.b32.xlu0 %v3088_v42, %s3155_s26  ;;  %v1994_v13 = vmul.f32 0.5, %v3088_v42 }
0x1464   :  { %v1995_v53 = vadd.f32 0.5, %v1994_v13 }
0x1466   :  { %v1996_v59 = vmul.f32 %v1995_v53, %v1745_v24 }
0x14a5   :  { %v2090_v45 = vpop.permute.xlu1 %2089 }
0x14a6   :  { %v2092_v47 = vmul.f32 %v2090_v45, %v2086_v44 }
0x14a8   :  { %2094 = vrot.lane.b32.xlu1 %v2092_v47, %s3156_s27 }
0x14d4   :  { %v1999_v25 = vpop.permute.xlu0 %1998 }
0x14d5   :  { %v2001_v48 = vmul.f32 %v1999_v25, %v1995_v53 }
0x14d7   :  { %2003 = vrot.lane.b32.xlu0 %v2001_v48, %s3156_s27 }
0x151a   :  { %v2095_v55 = vpop.permute.xlu1 %2094 }
0x151b   :  { %v2097_v57 = vadd.f32 %v2095_v55, %v2087_v50 }
0x151d   :  { %3089 = vtanh.f32 %v2097_v57 }
0x1527   :  { %v3090_v58 = vpop.eup %3089 }
0x1528   :  { %2100 = vrot.lane.b32.xlu1 %v3090_v58, %s3155_s26 }
0x1549   :  { %v2004_v60 = vpop.permute.xlu0 %2003 }
0x154a   :  { %v2006_v61 = vadd.f32 %v2004_v60, %v1996_v59 }
0x154c   :  { %3091 = vtanh.f32 %v2006_v61 }
0x1556   :  { %v3092_v62 = vpop.eup %3091 }
0x1557   :  { %2009 = vrot.lane.b32.xlu0 %v3092_v62, %s3155_s26 }
0x159a   :  { %v2101_v63 = vpop.permute.xlu1 %2100 }
0x159b   :  { %v2103_v2 = vmul.f32 %v2101_v63, %v2086_v44 }
0x159d   :  { %2180 = vrot.lane.b32.xlu1 %v2103_v2, %s3156_s27 }
0x15c9   :  { %v2010_v3 = vpop.permute.xlu0 %2009 }
0x15ca   :  { %v2012_v52 = vmul.f32 %v2010_v3, %v1995_v53 }
0x15cc   :  { %v2013_v4 = vadd.f32 %v2012_v52, %v1752_v32  ;;  %2105 = vrot.lane.b32.xlu0 %v2012_v52, %s3156_s27 }
0x160f   :  { %v2181_v6 = vpop.permute.xlu1 %2180 }
0x163e   :  { %v2106_v5 = vpop.permute.xlu0 %2105 }
0x163f   :  { %2822 = vmatmul.mubr.msk.f32.vlgmr.msra.gmra.mrb[22].mxu0 %vm188_vm2, %v2106_v5 }
0x1640   :  { %2990 = vmatpush3.bf16.msra.mxu0 %v3248_v41  ;;  %2832 = vmatprep.mubr.msk.f32.mxu0 %vm3153_vm0, %v3154_v1 }
0x1641   :  { %2991 = vmatprep.subr.bf16.mxu0 %v3152_v0 }
0x1644   :  { %2993 = vmatpush3.bf16.msra.mxu0 %v3259_v46 }
0x1647   :  { %2833 = vmatmul.mubr.msk.f32.vlgmr.msra.gmra.mrb[22].mxu0 %vm188_vm2, %v2181_v6 }
0x171a   :  { %v2250_v8 = vpop.f32.mrb[22].mxu0 }
0x171b   :  { %v3007_v7 = vadd.f32 %v3295_v56, %v2250_v8  ;;  %v2834_v9 = vpop.f32.mrb[23].mxu0  ;;  %v2279_v56 = vld [vmem:[#allocation2 + $0x98] sm:$0xff] }
0x171c   :  { %v2998_v19 = vpack.c.bf16 %v2279_v56, %v2278_v17 }
0x171d   :  { %3093 = vtanh.f32 %v3007_v7 }
0x171e   :  { %2999 = vmatpush3.bf16.msra.mxu1 %v2998_v19 }
0x1727   :  { %v3094_v10 = vpop.eup %3093 }
0x1728   :  { %2259 = vrot.lane.b32.xlu0 %v3094_v10, %s3155_s26  ;;  %v2255_v12 = vmul.f32 0.5, %v3094_v10 }
0x172a   :  { %v2256_v41 = vadd.f32 0.5, %v2255_v12 }
0x172c   :  { %v2257_v1 = vmul.f32 %v2256_v41, %v2006_v61 }
0x179a   :  { %v2260_v11 = vpop.permute.xlu0 %2259 }
0x179b   :  { %v2262_v14 = vmul.f32 %v2260_v11, %v2256_v41 }
0x179d   :  { %2264 = vrot.lane.b32.xlu1 %v2262_v14, %s3156_s27 }
0x180f   :  { %v2265_v15 = vpop.permute.xlu1 %2264 }
0x1810   :  { %v2267_v46 = vadd.f32 %v2265_v15, %v2257_v1 }
0x1812   :  { %3095 = vtanh.f32 %v2267_v46 }
0x181c   :  { %v3096_v20 = vpop.eup %3095 }
0x181d   :  { %2270 = vrot.lane.b32.xlu0 %v3096_v20, %s3155_s26 }
0x188f   :  { %v2271_v21 = vpop.permute.xlu0 %2270 }
0x1890   :  { %v2273_v22 = vmul.f32 %v2271_v21, %v2256_v41 }
0x1892   :  { %v2274_v23 = vadd.f32 %v2273_v22, %v2013_v4 }
0x1894   :  { %v2275_v49 = vmul.f32 0.125, %v2274_v23 }
0x1896   :  { %2286 = vrot.lane.b32.xlu1 %v2275_v49, %s3156_s27 }
0x1908   :  { %v2287_v24 = vpop.permute.xlu1 %2286 }
0x1909   :  { %2844 = vmatmul.mubr.msk.f32.vlgmr.msra.gmra.mrb[16].mxu1 %vm188_vm2, %v2287_v24 }
0x19dc   :  { %v2356_v27 = vpop.f32.mrb[16].mxu1 }
0x19dd   :  { %v2357_v28 = vadd.f32 %v2418_v26, %v2356_v27  ;;  %v2845_v29 = vpop.f32.mrb[17].mxu1 }
0x19df   :  { %2360 = vmax.xlane.f32.xlu0 %v2357_v28 }
0x1a6c   :  { %v2361_v30 = vpop.xlane.xlu0 %2360 }
0x1a6d   :  { %v2362_v0 = vsub.f32 %v2357_v28, %v2361_v30 }
0x1a6f   :  { %v2363_v32 = vmul.f32 1.442695, %v2362_v0 }
0x1a71   :  { %3097 = vpow2.f32 %v2363_v32 }
0x1a7b   :  { %v3098_v33 = vpop.eup %3097 }
0x1a7c   :  { %2365 = vadd.xlane.f32.xlu1 %v3098_v33 }
0x1b09   :  { %v2366_v34 = vpop.xlane.xlu1 %2365 }
0x1b0a   :  { %3099 = vlog2.f32 %v2366_v34 }
0x1b14   :  { %v3100_v31 = vpop.eup %3099 }
0x1b15   :  { %v2368_v36 = vmul.f32 0.6931472, %v3100_v31 }
0x1b17   :  { %v2369_v35 = vsub.f32 %v2362_v0, %v2368_v36 }
0x1b19   :  { %2370 = vst [vmem:[#allocation5] sm:$0xff] %v2369_v35 }
0x1b1a   :  { %3134 = shalt.err (!%p3131_p12)
}
0x1b1b   :  { %s3135_s16 = scalar_lea.hbm %s3529_s2, 128 }
0x1b1c   :  { %p3136_p13 = scmp.ne.s32.totalorder %s3529_s2, %s3135_s16  ;;  %p3139_p0 = scmp.lt.u32.totalorder %s3135_s16, %s3529_s2 }
0x1b1e   :  { %p3141_p1 = pnand %p3139_p0, %p3136_p13 }
0x1b20   :  { %3144 = shalt.err (!%p3141_p1)
}
0x1b21   :  { %2380 = dma.vmem_to_hbm [thread:$0]  %s2378_s12, 128, %s3529_s2, [#allocation4]  }
0x1b22   :  { %3147 = dma.done.wait [#allocation4], 128  }
0x1b23   :  { %3148 = vsyncadd [#allocation4], 4294967168 }
0x1b24   :  { %2384 = vsyncpa [#allocation3], 1 }
0x1b25   :  { %2385 = vsyncpa [#allocation4], 1 }

</bundles_post_ra>
